<compile_context>
chip_gen: v7x
topology: tpu7x:2x2x1
jax: 0.10.0
libtpu: 0.0.40
codegen_flags: <defaults>
</compile_context>

<pallas_src>
import jax
import jax.numpy as jnp
from jax.experimental import pallas as pl
from jax.experimental.pallas import tpu as pltpu

_OUT_REAL = 6      # true fc4 output width
_OUT_PAD = 128     # lane-dense padded output width


def _round_up(x, m):
    return ((x + m - 1) // m) * m


def mlp_kernel(x_ref, w1_ref, b1_ref, w2_ref, b2_ref, w3_ref, b3_ref,
               w4_ref, b4_ref, o_ref):
    """Fused 4-layer MLP on one (TM, F) batch tile.

    Weights are bf16 (MXU-native); accumulation / bias / ReLU are f32.
    """
    x = x_ref[...].astype(jnp.bfloat16)

    h1 = jnp.dot(x, w1_ref[...], preferred_element_type=jnp.float32) + b1_ref[...]
    h1 = jnp.maximum(h1, 0.0)                     # Dropout(eval) = identity, then ReLU

    h2 = jnp.dot(h1.astype(jnp.bfloat16), w2_ref[...],
                 preferred_element_type=jnp.float32) + b2_ref[...]
    h2 = jnp.maximum(h2, 0.0)

    h3 = jnp.dot(h2.astype(jnp.bfloat16), w3_ref[...],
                 preferred_element_type=jnp.float32) + b3_ref[...]
    h3 = jnp.maximum(h3, 0.0)

    out = jnp.dot(h3.astype(jnp.bfloat16), w4_ref[...],
                  preferred_element_type=jnp.float32) + b4_ref[...]
    o_ref[...] = out.astype(o_ref.dtype)


def linear_regression_forward(x, params, *, tm=256):
    """x: (B, num_features) float32. params: dict of bf16 weights + f32 biases.

    Returns (B, 6) float32.
    """
    B, F = x.shape
    w1, b1 = params["w1"], params["b1"]
    w2, b2 = params["w2"], params["b2"]
    w3, b3 = params["w3"], params["b3"]
    w4, b4 = params["w4"], params["b4"]   # w4/b4 padded to _OUT_PAD lanes

    # Batch tile: at least a multiple of 8 sublanes, at most `tm` rows.
    TM = min(tm, _round_up(B, 8))
    B_pad = _round_up(B, TM)
    if B_pad != B:
        x = jnp.pad(x, ((0, B_pad - B), (0, 0)))

    grid = (pl.cdiv(B_pad, TM),)

    # Weights / biases: full-array blocks with constant index_map -> stay
    # resident in VMEM across every batch tile.
    def resident(arr):
        return pl.BlockSpec(arr.shape, lambda i: (0, 0))

    in_specs = [
        pl.BlockSpec((TM, F), lambda i: (i, 0)),   # streamed x tile
        resident(w1), resident(b1),
        resident(w2), resident(b2),
        resident(w3), resident(b3),
        resident(w4), resident(b4),
    ]
    out_specs = pl.BlockSpec((TM, _OUT_PAD), lambda i: (i, 0))

    out_padded = pl.pallas_call(
        mlp_kernel,
        out_shape=jax.ShapeDtypeStruct((B_pad, _OUT_PAD), jnp.float32),
        grid=grid,
        in_specs=in_specs,
        out_specs=out_specs,
        compiler_params=pltpu.CompilerParams(
            dimension_semantics=("parallel",)),   # v7x: shard batch tiles over 2 TCs
    )(x, w1, b1, w2, b2, w3, b3, w4, b4)

    return out_padded[:B, :_OUT_REAL]


def _xavier_uniform(key, fan_in, fan_out):
    """Matches torch.nn.init.xavier_uniform_ for a Linear(fan_in -> fan_out).

    Returned transposed as (fan_in, fan_out) for direct x @ W matmul."""
    limit = (6.0 / (fan_in + fan_out)) ** 0.5
    return jax.random.uniform(key, (fan_in, fan_out), jnp.float32, -limit, limit)


def init_params(key, num_features):
    k1, k2, k3, k4 = jax.random.split(key, 4)
    w4 = _xavier_uniform(k4, 512, _OUT_REAL)
    # Pad fc4 to a lane-dense 128-wide output (extra columns are zero).
    w4 = jnp.pad(w4, ((0, 0), (0, _OUT_PAD - _OUT_REAL)))
    return {
        # Weights stored in bf16: halves HBM->VMEM traffic, MXU-native on all gens.
        "w1": _xavier_uniform(k1, num_features, 512).astype(jnp.bfloat16),
        "b1": jnp.zeros((1, 512), jnp.float32),
        "w2": _xavier_uniform(k2, 512, 1024).astype(jnp.bfloat16),
        "b2": jnp.zeros((1, 1024), jnp.float32),
        "w3": _xavier_uniform(k3, 1024, 512).astype(jnp.bfloat16),
        "b3": jnp.zeros((1, 512), jnp.float32),
        "w4": w4.astype(jnp.bfloat16),
        "b4": jnp.zeros((1, _OUT_PAD), jnp.float32),
    }


def _ref_forward(x, params):
    """Pure-JAX reference using the same mixed precision as the kernel."""
    def layer(h, w, b, relu):
        y = jnp.dot(h.astype(jnp.bfloat16), w,
                    preferred_element_type=jnp.float32) + b
        return jnp.maximum(y, 0.0) if relu else y

    h = layer(x, params["w1"], params["b1"], True)
    h = layer(h, params["w2"], params["b2"], True)
    h = layer(h, params["w3"], params["b3"], True)
    out = layer(h, params["w4"], params["b4"], False)
    return out[:, :_OUT_REAL]


if __name__ == "__main__":
    key = jax.random.PRNGKey(0)
    k_params, k_x = jax.random.split(key)

    num_features = 32
    batch = 8

    params = init_params(k_params, num_features)
    x = jax.random.normal(k_x, (batch, num_features), jnp.float32)

    out = linear_regression_forward(x, params)
    out = jax.block_until_ready(out)
    assert out.shape == (batch, _OUT_REAL), out.shape

    ref = _ref_forward(x, params)
    assert jnp.allclose(out, ref, atol=1e-2, rtol=1e-2), (
        float(jnp.max(jnp.abs(out - ref))))

    print("KERNEL_OK")
</pallas_src>

<mosaic_0001>
module attributes {stable_mosaic.version = 11 : i64} {
  func.func @mlp_kernel(%arg0: i32, %arg1: memref<8x32xf32, #tpu.memory_space<vmem>>, %arg2: memref<32x512xbf16, #tpu.memory_space<vmem>>, %arg3: memref<1x512xf32, #tpu.memory_space<vmem>>, %arg4: memref<512x1024xbf16, #tpu.memory_space<vmem>>, %arg5: memref<1x1024xf32, #tpu.memory_space<vmem>>, %arg6: memref<1024x512xbf16, #tpu.memory_space<vmem>>, %arg7: memref<1x512xf32, #tpu.memory_space<vmem>>, %arg8: memref<512x128xbf16, #tpu.memory_space<vmem>>, %arg9: memref<1x128xf32, #tpu.memory_space<vmem>>, %arg10: memref<8x128xf32, #tpu.memory_space<vmem>>) attributes {dimension_semantics = [#tpu.dimension_semantics<parallel>], iteration_bounds = array<i64: 1>, scalar_prefetch = 0 : i64, scratch_operands = 0 : i64, tpu.core_type = #tpu.core_type<tc>, window_params = [{transform_indices = @transform_0, window_bounds = array<i64: 8, 32>}, {pipeline_mode = #tpu.pipeline_mode<synchronous>, transform_indices = @transform_1, window_bounds = array<i64: 32, 512>}, {pipeline_mode = #tpu.pipeline_mode<synchronous>, transform_indices = @transform_2, window_bounds = array<i64: 1, 512>}, {pipeline_mode = #tpu.pipeline_mode<synchronous>, transform_indices = @transform_3, window_bounds = array<i64: 512, 1024>}, {pipeline_mode = #tpu.pipeline_mode<synchronous>, transform_indices = @transform_4, window_bounds = array<i64: 1, 1024>}, {pipeline_mode = #tpu.pipeline_mode<synchronous>, transform_indices = @transform_5, window_bounds = array<i64: 1024, 512>}, {pipeline_mode = #tpu.pipeline_mode<synchronous>, transform_indices = @transform_6, window_bounds = array<i64: 1, 512>}, {pipeline_mode = #tpu.pipeline_mode<synchronous>, transform_indices = @transform_7, window_bounds = array<i64: 512, 128>}, {pipeline_mode = #tpu.pipeline_mode<synchronous>, transform_indices = @transform_8, window_bounds = array<i64: 1, 128>}, {transform_indices = @transform_9, window_bounds = array<i64: 8, 128>}]} {
    %c0 = arith.constant 0 : index
    %c0_0 = arith.constant 0 : index
    %0 = vector.load %arg1[%c0, %c0_0] : memref<8x32xf32, #tpu.memory_space<vmem>>, vector<8x32xf32>
    %1 = arith.truncf %0 : vector<8x32xf32> to vector<8x32xbf16>
    %c0_1 = arith.constant 0 : index
    %c0_2 = arith.constant 0 : index
    %2 = vector.load %arg2[%c0_1, %c0_2] : memref<32x512xbf16, #tpu.memory_space<vmem>>, vector<32x512xbf16>
    %cst = arith.constant dense<0.000000e+00> : vector<8x512xf32>
    %3 = tpu.matmul %1, %2, %cst {dimension_numbers = #tpu.dot_dimension_numbers<[1], [0], [0], [1], [0, 0, 1, 1], [], []>} : vector<8x32xbf16>, vector<32x512xbf16>, vector<8x512xf32> -> vector<8x512xf32>
    %c0_3 = arith.constant 0 : index
    %c0_4 = arith.constant 0 : index
    %4 = vector.load %arg3[%c0_3, %c0_4] : memref<1x512xf32, #tpu.memory_space<vmem>>, vector<1x512xf32>
    %5 = vector.broadcast %4 : vector<1x512xf32> to vector<8x512xf32>
    %6 = arith.addf %3, %5 : vector<8x512xf32>
    %cst_5 = arith.constant 0.000000e+00 : f32
    %7 = vector.broadcast %cst_5 : f32 to vector<8x512xf32>
    %8 = arith.maximumf %6, %7 : vector<8x512xf32>
    %9 = arith.truncf %8 : vector<8x512xf32> to vector<8x512xbf16>
    %c0_6 = arith.constant 0 : index
    %c0_7 = arith.constant 0 : index
    %10 = vector.load %arg4[%c0_6, %c0_7] : memref<512x1024xbf16, #tpu.memory_space<vmem>>, vector<512x1024xbf16>
    %cst_8 = arith.constant dense<0.000000e+00> : vector<8x1024xf32>
    %11 = tpu.matmul %9, %10, %cst_8 {dimension_numbers = #tpu.dot_dimension_numbers<[1], [0], [0], [1], [0, 0, 1, 1], [], []>} : vector<8x512xbf16>, vector<512x1024xbf16>, vector<8x1024xf32> -> vector<8x1024xf32>
    %c0_9 = arith.constant 0 : index
    %c0_10 = arith.constant 0 : index
    %12 = vector.load %arg5[%c0_9, %c0_10] : memref<1x1024xf32, #tpu.memory_space<vmem>>, vector<1x1024xf32>
    %13 = vector.broadcast %12 : vector<1x1024xf32> to vector<8x1024xf32>
    %14 = arith.addf %11, %13 : vector<8x1024xf32>
    %cst_11 = arith.constant 0.000000e+00 : f32
    %15 = vector.broadcast %cst_11 : f32 to vector<8x1024xf32>
    %16 = arith.maximumf %14, %15 : vector<8x1024xf32>
    %17 = arith.truncf %16 : vector<8x1024xf32> to vector<8x1024xbf16>
    %c0_12 = arith.constant 0 : index
    %c0_13 = arith.constant 0 : index
    %18 = vector.load %arg6[%c0_12, %c0_13] : memref<1024x512xbf16, #tpu.memory_space<vmem>>, vector<1024x512xbf16>
    %cst_14 = arith.constant dense<0.000000e+00> : vector<8x512xf32>
    %19 = tpu.matmul %17, %18, %cst_14 {dimension_numbers = #tpu.dot_dimension_numbers<[1], [0], [0], [1], [0, 0, 1, 1], [], []>} : vector<8x1024xbf16>, vector<1024x512xbf16>, vector<8x512xf32> -> vector<8x512xf32>
    %c0_15 = arith.constant 0 : index
    %c0_16 = arith.constant 0 : index
    %20 = vector.load %arg7[%c0_15, %c0_16] : memref<1x512xf32, #tpu.memory_space<vmem>>, vector<1x512xf32>
    %21 = vector.broadcast %20 : vector<1x512xf32> to vector<8x512xf32>
    %22 = arith.addf %19, %21 : vector<8x512xf32>
    %cst_17 = arith.constant 0.000000e+00 : f32
    %23 = vector.broadcast %cst_17 : f32 to vector<8x512xf32>
    %24 = arith.maximumf %22, %23 : vector<8x512xf32>
    %25 = arith.truncf %24 : vector<8x512xf32> to vector<8x512xbf16>
    %c0_18 = arith.constant 0 : index
    %c0_19 = arith.constant 0 : index
    %26 = vector.load %arg8[%c0_18, %c0_19] : memref<512x128xbf16, #tpu.memory_space<vmem>>, vector<512x128xbf16>
    %cst_20 = arith.constant dense<0.000000e+00> : vector<8x128xf32>
    %27 = tpu.matmul %25, %26, %cst_20 {dimension_numbers = #tpu.dot_dimension_numbers<[1], [0], [0], [1], [0, 0, 1, 1], [], []>} : vector<8x512xbf16>, vector<512x128xbf16>, vector<8x128xf32> -> vector<8x128xf32>
    %c0_21 = arith.constant 0 : index
    %c0_22 = arith.constant 0 : index
    %28 = vector.load %arg9[%c0_21, %c0_22] : memref<1x128xf32, #tpu.memory_space<vmem>>, vector<1x128xf32>
    %29 = vector.broadcast %28 : vector<1x128xf32> to vector<8x128xf32>
    %30 = arith.addf %27, %29 : vector<8x128xf32>
    %c0_23 = arith.constant 0 : index
    %c0_24 = arith.constant 0 : index
    %31 = vector.load %arg10[%c0_23, %c0_24] : memref<8x128xf32, #tpu.memory_space<vmem>>, vector<8x128xf32>
    tpu.vector_store %arg10[%c0_23, %c0_24], %30 {strides = array<i32>} : memref<8x128xf32, #tpu.memory_space<vmem>>, vector<8x128xf32>,
    return
  }
  func.func @transform_0(%arg0: i32) -> (i32, i32) {
    %c0_i32 = arith.constant 0 : i32
    %c0_i32_0 = arith.constant 0 : i32
    return %arg0, %c0_i32 : i32, i32
  }
  func.func @transform_1(%arg0: i32) -> (i32, i32) {
    %c0_i32 = arith.constant 0 : i32
    %c0_i32_0 = arith.constant 0 : i32
    %c0_i32_1 = arith.constant 0 : i32
    return %c0_i32, %c0_i32_0 : i32, i32
  }
  func.func @transform_2(%arg0: i32) -> (i32, i32) {
    %c0_i32 = arith.constant 0 : i32
    %c0_i32_0 = arith.constant 0 : i32
    %c0_i32_1 = arith.constant 0 : i32
    return %c0_i32, %c0_i32_0 : i32, i32
  }
  func.func @transform_3(%arg0: i32) -> (i32, i32) {
    %c0_i32 = arith.constant 0 : i32
    %c0_i32_0 = arith.constant 0 : i32
    %c0_i32_1 = arith.constant 0 : i32
    return %c0_i32, %c0_i32_0 : i32, i32
  }
  func.func @transform_4(%arg0: i32) -> (i32, i32) {
    %c0_i32 = arith.constant 0 : i32
    %c0_i32_0 = arith.constant 0 : i32
    %c0_i32_1 = arith.constant 0 : i32
    return %c0_i32, %c0_i32_0 : i32, i32
  }
  func.func @transform_5(%arg0: i32) -> (i32, i32) {
    %c0_i32 = arith.constant 0 : i32
    %c0_i32_0 = arith.constant 0 : i32
    %c0_i32_1 = arith.constant 0 : i32
    return %c0_i32, %c0_i32_0 : i32, i32
  }
  func.func @transform_6(%arg0: i32) -> (i32, i32) {
    %c0_i32 = arith.constant 0 : i32
    %c0_i32_0 = arith.constant 0 : i32
    %c0_i32_1 = arith.constant 0 : i32
    return %c0_i32, %c0_i32_0 : i32, i32
  }
  func.func @transform_7(%arg0: i32) -> (i32, i32) {
    %c0_i32 = arith.constant 0 : i32
    %c0_i32_0 = arith.constant 0 : i32
    %c0_i32_1 = arith.constant 0 : i32
    return %c0_i32, %c0_i32_0 : i32, i32
  }
  func.func @transform_8(%arg0: i32) -> (i32, i32) {
    %c0_i32 = arith.constant 0 : i32
    %c0_i32_0 = arith.constant 0 : i32
    %c0_i32_1 = arith.constant 0 : i32
    return %c0_i32, %c0_i32_0 : i32, i32
  }
  func.func @transform_9(%arg0: i32) -> (i32, i32) {
    %c0_i32 = arith.constant 0 : i32
    %c0_i32_0 = arith.constant 0 : i32
    return %arg0, %c0_i32 : i32, i32
  }
}

</mosaic_0001>

<bundles_post_ra>
// kernel: tpu_custom_call.1
= control target key start
LH: loop header
LB: loop body
LE: loop exit
PB: predicated region body
PF: predicated region fallthrough
CT: control target
= control target key end

     0   :  { %14 = vsyncpa [#allocation3], 0  ;;  %s5903_s0 = inlined_call_operand.hbm [shape: f32[8,32], index: 0, kind: input, shape index: {}]   ;;  %s5904_s1 = inlined_call_operand.hbm [shape: bf16[32,512], index: 1, kind: input, shape index: {}]   ;;  %s5905_s2 = inlined_call_operand.vmem [shape: f32[1,512], index: 2, kind: input, shape index: {}]   ;;  %s5906_s3 = inlined_call_operand.hbm [shape: bf16[512,1024], index: 3, kind: input, shape index: {}]   ;;  %s5907_s4 = inlined_call_operand.vmem [shape: f32[1,1024], index: 4, kind: input, shape index: {}]   ;;  %s5908_s5 = inlined_call_operand.hbm [shape: bf16[1024,512], index: 5, kind: input, shape index: {}]   ;;  %s5909_s6 = inlined_call_operand.vmem [shape: f32[1,512], index: 6, kind: input, shape index: {}]   ;;  %s5910_s7 = inlined_call_operand.hbm [shape: bf16[512,128], index: 7, kind: input, shape index: {}]   ;;  %s5911_s8 = inlined_call_operand.vmem [shape: f32[1,128], index: 8, kind: input, shape index: {}]   ;;  %s5912_s9 = inlined_call_operand.hbm [shape: f32[8,128], index: 9, kind: output, shape index: {}]  }
   0x1   :  { %15 = vsyncpa [#allocation6], 0 }
   0x2   :  { %16 = vsyncpa [#allocation9], 0 }
   0x3   :  { %17 = vsyncpa [#allocation4], 0  ;;  %s5675_s30 = smov [#allocation5]   ;;  %s5535_s13 = scalar_lea.hbm %s5904_s1, 1024 }
   0x4   :  { %s33_s10 = sshll.u32 %s5675_s30, 4  ;;  %p5536_p0 = scmp.ne.s32.totalorder %s5904_s1, %s5535_s13  ;;  %s34_s10 = int_to_ptr.vmem [resolvable:$true] %s33_s10 }
   0x5   :  { %p5539_p1 = scmp.lt.u32.totalorder %s5535_s13, %s5904_s1 }
   0x7   :  { %p5541_p2 = pnand %p5539_p1, %p5536_p0 }
   0x9   :  { %5544 = shalt.err (!%p5541_p2)
}
   0xa   :  { %s5545_s18 = scalar_lea.vmem %s34_s10, 1024  ;;  %p5550_p4 = scmp.lt.s32.totalorder %s34_s10, %s34_s10 }
   0xb   :  { %p5546_p3 = scmp.ne.s32.totalorder %s34_s10, %s5545_s18  ;;  %p5551_p5 = scmp.lt.s32.totalorder %s5545_s18, %s5545_s18 }
   0xd   :  { %p5552_p6 = por %p5551_p5, %p5550_p4 }
   0xf   :  { %p5553_p7 = pnand %p5552_p6, %p5546_p3 }
  0x11   :  { %5556 = shalt.err (!%p5553_p7)
}
  0x12   :  { %s5676_s19 = smov 256   ;;  %s5677_s20 = smov 16  }
  0x13   :  { %39 = dma.hbm_to_vmem [thread:$0]  %s5904_s1, 1024, %s34_s10, [#allocation6], %s5676_s19, %s5676_s19, %s5677_s20  }
  0x14   :  { %s5678_s23 = smov [#allocation8]   ;;  %s5679_s25 = smov [#allocation2]  }
  0x15   :  { %s61_s24 = sshll.u32 %s5678_s23, 4  ;;  %s24_s26 = sshll.u32 %s5679_s25, 4  ;;  %s62_s24 = int_to_ptr.vmem [resolvable:$true] %s61_s24  ;;  %s25_s26 = int_to_ptr.vmem [resolvable:$true] %s24_s26 }
  0x16   :  { %s5557_s29 = scalar_lea.hbm %s5908_s5, 32768 }
  0x17   :  { %p5558_p8 = scmp.ne.s32.totalorder %s5908_s5, %s5557_s29  ;;  %p5561_p9 = scmp.lt.u32.totalorder %s5557_s29, %s5908_s5 }
  0x19   :  { %p5563_p10 = pnand %p5561_p9, %p5558_p8 }
  0x1b   :  { %5566 = shalt.err (!%p5563_p10)
}
  0x1c   :  { %s5567_s1 = scalar_lea.vmem %s62_s24, 32768  ;;  %p5572_p12 = scmp.lt.s32.totalorder %s62_s24, %s62_s24 }
  0x1d   :  { %p5568_p11 = scmp.ne.s32.totalorder %s62_s24, %s5567_s1  ;;  %p5573_p13 = scmp.lt.s32.totalorder %s5567_s1, %s5567_s1 }
  0x1f   :  { %p5574_p0 = por %p5573_p13, %p5572_p12 }
  0x21   :  { %p5575_p1 = pnand %p5574_p0, %p5568_p11 }
  0x23   :  { %5578 = shalt.err (!%p5575_p1)
}
  0x24   :  { %67 = dma.hbm_to_vmem [thread:$0]  %s5908_s5, 32768, %s62_s24, [#allocation9], %s5676_s19, %s5676_s19, %s5677_s20  }
  0x25   :  { %s5579_s17 = scalar_lea.hbm %s5903_s0, 128 }
  0x26   :  { %p5580_p2 = scmp.ne.s32.totalorder %s5903_s0, %s5579_s17  ;;  %p5583_p3 = scmp.lt.u32.totalorder %s5579_s17, %s5903_s0 }
  0x28   :  { %p5585_p4 = pnand %p5583_p3, %p5580_p2 }
  0x2a   :  { %5588 = shalt.err (!%p5585_p4)
}
  0x2b   :  { %s5589_s25 = scalar_lea.vmem %s25_s26, 128  ;;  %p5594_p6 = scmp.lt.s32.totalorder %s25_s26, %s25_s26 }
  0x2c   :  { %p5590_p5 = scmp.ne.s32.totalorder %s25_s26, %s5589_s25  ;;  %p5595_p7 = scmp.lt.s32.totalorder %s5589_s25, %s5589_s25 }
  0x2e   :  { %p5596_p8 = por %p5595_p7, %p5594_p6 }
  0x30   :  { %p5597_p9 = pnand %p5596_p8, %p5590_p5 }
  0x32   :  { %5600 = shalt.err (!%p5597_p9)
}
  0x33   :  { %27 = dma.hbm_to_vmem [thread:$0]  %s5903_s0, 128, %s25_s26, [#allocation3]  }
  0x34   :  { %s5680_s20 = smov [#allocation7]   ;;  %s5601_s29 = scalar_lea.hbm %s5906_s3, 32768 }
  0x35   :  { %s47_s24 = sshll.u32 %s5680_s20, 4  ;;  %p5602_p10 = scmp.ne.s32.totalorder %s5906_s3, %s5601_s29  ;;  %s48_s24 = int_to_ptr.vmem [resolvable:$true] %s47_s24 }
  0x36   :  { %p5605_p11 = scmp.lt.u32.totalorder %s5601_s29, %s5906_s3 }
  0x38   :  { %p5607_p12 = pnand %p5605_p11, %p5602_p10 }
  0x3a   :  { %5610 = shalt.err (!%p5607_p12)
}
  0x3b   :  { %s5611_s1 = scalar_lea.vmem %s48_s24, 32768  ;;  %p5616_p0 = scmp.lt.s32.totalorder %s48_s24, %s48_s24 }
  0x3c   :  { %p5612_p13 = scmp.ne.s32.totalorder %s48_s24, %s5611_s1  ;;  %p5617_p1 = scmp.lt.s32.totalorder %s5611_s1, %s5611_s1 }
  0x3e   :  { %p5618_p2 = por %p5617_p1, %p5616_p0 }
  0x40   :  { %p5619_p3 = pnand %p5618_p2, %p5612_p13 }
  0x42   :  { %5622 = shalt.err (!%p5619_p3)
}
  0x43   :  { %s5681_s0 = smov 512   ;;  %s5682_s26 = smov 32  }
  0x44   :  { %53 = dma.hbm_to_vmem [thread:$0]  %s5906_s3, 32768, %s48_s24, [#allocation6], %s5681_s0, %s5681_s0, %s5682_s26  }
  0x45   :  { %s5683_s15 = smov [#allocation10]   ;;  %s5623_s21 = scalar_lea.hbm %s5910_s7, 4096 }
  0x46   :  { %s75_s16 = sshll.u32 %s5683_s15, 4  ;;  %p5624_p4 = scmp.ne.s32.totalorder %s5910_s7, %s5623_s21  ;;  %s76_s16 = int_to_ptr.vmem [resolvable:$true] %s75_s16 }
  0x47   :  { %p5627_p5 = scmp.lt.u32.totalorder %s5623_s21, %s5910_s7 }
  0x49   :  { %p5629_p6 = pnand %p5627_p5, %p5624_p4 }
  0x4b   :  { %5632 = shalt.err (!%p5629_p6)
}
  0x4c   :  { %s5633_s19 = scalar_lea.vmem %s76_s16, 4096  ;;  %p5638_p8 = scmp.lt.s32.totalorder %s76_s16, %s76_s16 }
  0x4d   :  { %p5634_p7 = scmp.ne.s32.totalorder %s76_s16, %s5633_s19  ;;  %p5639_p9 = scmp.lt.s32.totalorder %s5633_s19, %s5633_s19 }
  0x4f   :  { %p5640_p10 = por %p5639_p9, %p5638_p8 }
  0x51   :  { %p5641_p11 = pnand %p5640_p10, %p5634_p7 }
  0x53   :  { %5644 = shalt.err (!%p5641_p11)
}
  0x54   :  { %s5684_s3 = smov 64   ;;  %s5685_s20 = smov 4  }
  0x55   :  { %81 = dma.hbm_to_vmem [thread:$0]  %s5910_s7, 4096, %s76_s16, [#allocation9], %s5684_s3, %s5684_s3, %s5685_s20  }
  0x56   :  { %5667 = dma.done.wait [#allocation3], 128  }
  0x57   :  { %5668 = vsyncadd [#allocation3], 4294967168 }
  0x58   :  { %5669 = dma.done.wait [#allocation6], 33792  }
  0x59   :  { %5670 = vsyncadd [#allocation6], 4294933504 }
  0x5a   :  { %5671 = dma.done.wait [#allocation9], 36864  }
  0x5b   :  { %5672 = vsyncadd [#allocation9], 4294930432  ;;  %v5686_v0 = vmov 0   ;;  %v5107_v1 = vld [vmem:[#allocation5 + $0x4] ss:$16 sps:$4 sm:$0xff]   ;;  %v100_v5 = vld [vmem:[#allocation2] sm:$0xff] }
  0x5c   :  { %208 = vmatprep.mubr.bf16.mxu0 %v5686_v0  ;;  %249 = vmatprep.mubr.bf16.mxu1 %v5686_v0  ;;  %v5109_v2 = vld [vmem:[#allocation5] ss:$16 sps:$4 sm:$0xff]   ;;  %v5110_v3 = vld [vmem:[#allocation5 + $0x24] ss:$16 sps:$4 sm:$0xff]   ;;  %v5113_v6 = vld [vmem:[#allocation5 + $0xc] ss:$16 sps:$4 sm:$0xff]   ;;  %v101_v11 = vpack.c.bf16 %v100_v5, %v100_v5 }
  0x5d   :  { %176 = vmatprep.subr.bf16.mxu0 %v5107_v1  ;;  %v5112_v4 = vld [vmem:[#allocation5 + $0x20] ss:$16 sps:$4 sm:$0xff]   ;;  %v5115_v7 = vld [vmem:[#allocation5 + $0x8] ss:$16 sps:$4 sm:$0xff]   ;;  %217 = vmatprep.subr.bf16.mxu1 %v5113_v6  ;;  %v5116_v8 = vld [vmem:[#allocation5 + $0x2c] ss:$16 sps:$4 sm:$0xff]  }
  0x5e   :  { %177 = vmatpush1.bf16.msra.mxu0 %v5109_v2  ;;  %v5118_v9 = vld [vmem:[#allocation5 + $0x28] ss:$16 sps:$4 sm:$0xff]   ;;  %v266_v10 = vld [vmem:[#allocation7] sm:$0xff]  ;;  %218 = vmatpush1.bf16.msra.mxu1 %v5115_v7  ;;  %vm172_vm0 = vcmask 261120   ;;  %s5687_s12 = smov [#allocation11]  }
  0x5f   :  { %178 = vmatprep.subr.bf16.mxu0 %v5110_v3  ;;  %v270_v12 = vld [vmem:[#allocation7 + $0x20] sm:$0xff]  ;;  %v267_v13 = vld [vmem:[#allocation7 + $0x8] sm:$0xff]  ;;  %219 = vmatprep.subr.bf16.mxu1 %v5116_v8  ;;  %s4432_s13 = sshll.u32 %s5687_s12, 4  ;;  %s4433_s13 = int_to_ptr.vmem [resolvable:$true] %s4432_s13 }
  0x60   :  { %v271_v14 = vld [vmem:[#allocation7 + $0x28] sm:$0xff]  ;;  %v4453_v15 = vcombine.low %v266_v10, %v270_v12  ;;  %v4454_v16 = vcombine.high %v266_v10, %v270_v12  ;;  %v274_v17 = vld [vmem:[#allocation7 + $0x40] sm:$0xff]  ;;  %s5645_s1 = scalar_lea.vmem %s4433_s13, 128  ;;  %p5650_p13 = scmp.lt.s32.totalorder %s4433_s13, %s4433_s13 }
  0x61   :  { %v278_v18 = vld [vmem:[#allocation7 + $0x60] sm:$0xff]  ;;  %v4456_v19 = vcombine.high %v267_v13, %v271_v14  ;;  %v275_v21 = vld [vmem:[#allocation7 + $0x48] sm:$0xff]  ;;  %v4455_v25 = vcombine.low %v267_v13, %v271_v14  ;;  %p5646_p12 = scmp.ne.s32.totalorder %s4433_s13, %s5645_s1  ;;  %p5651_p0 = scmp.lt.s32.totalorder %s5645_s1, %s5645_s1 }
  0x62   :  { %179 = vmatpush1.bf16.msra.mxu0 %v5112_v4  ;;  %v4462_v20 = vcombine.high %v274_v17, %v278_v18  ;;  %v279_v22 = vld [vmem:[#allocation7 + $0x68] sm:$0xff]  ;;  %v282_v23 = vld [vmem:[#allocation7 + $0x80] sm:$0xff]  ;;  %220 = vmatpush1.bf16.msra.mxu1 %v5118_v9  ;;  %v4461_v26 = vcombine.low %v274_v17, %v278_v18 }
  0x63   :  { %1844 = vmatprep.subr.bf16.mxu0 %v4454_v16  ;;  %v286_v24 = vld [vmem:[#allocation7 + $0xa0] sm:$0xff]  ;;  %1926 = vmatprep.subr.bf16.mxu1 %v4456_v19  ;;  %v4464_v27 = vcombine.high %v275_v21, %v279_v22  ;;  %v283_v29 = vld [vmem:[#allocation7 + $0x88] sm:$0xff]  ;;  %v4463_v33 = vcombine.low %v275_v21, %v279_v22  ;;  %p5652_p1 = por %p5651_p0, %p5650_p13 }
  0x64   :  { %v4470_v28 = vcombine.high %v282_v23, %v286_v24  ;;  %v287_v30 = vld [vmem:[#allocation7 + $0xa8] sm:$0xff]  ;;  %v290_v31 = vld [vmem:[#allocation7 + $0xc0] sm:$0xff]  ;;  %v4469_v34 = vcombine.low %v282_v23, %v286_v24 }
  0x65   :  { %4451 = vmatmul.mubr.msk.bf16.vlgmr.msra.gmra.mrb[0].mxu0 %vm172_vm0, %v101_v11  ;;  %4452 = vmatmul.mubr.msk.bf16.vlgmr.msra.gmra.mrb[0].mxu1 %vm172_vm0, %v101_v11  ;;  %v294_v32 = vld [vmem:[#allocation7 + $0xe0] sm:$0xff]  ;;  %v4472_v35 = vcombine.high %v283_v29, %v287_v30  ;;  %v291_v37 = vld [vmem:[#allocation7 + $0xc8] sm:$0xff]  ;;  %v4471_v41 = vcombine.low %v283_v29, %v287_v30  ;;  %p5653_p2 = pnand %p5652_p1, %p5646_p12 }
  0x66   :  { %1845 = vmatpush1.bf16.msra.mxu0 %v4453_v15  ;;  %1927 = vmatpush1.bf16.msra.mxu1 %v4455_v25  ;;  %v4478_v36 = vcombine.high %v290_v31, %v294_v32  ;;  %v295_v38 = vld [vmem:[#allocation7 + $0xe8] sm:$0xff]  ;;  %v298_v39 = vld [vmem:[#allocation7 + $0x100] sm:$0xff]  ;;  %v4477_v42 = vcombine.low %v290_v31, %v294_v32 }
  0x67   :  { %1846 = vmatprep.subr.bf16.mxu0 %v4462_v20  ;;  %1928 = vmatprep.subr.bf16.mxu1 %v4464_v27  ;;  %v302_v40 = vld [vmem:[#allocation7 + $0x120] sm:$0xff]  ;;  %v4480_v43 = vcombine.high %v291_v37, %v295_v38  ;;  %v299_v45 = vld [vmem:[#allocation7 + $0x108] sm:$0xff]  ;;  %v4479_v49 = vcombine.low %v291_v37, %v295_v38 }
  0x68   :  { %v4486_v44 = vcombine.high %v298_v39, %v302_v40  ;;  %v303_v46 = vld [vmem:[#allocation7 + $0x128] sm:$0xff]  ;;  %v306_v47 = vld [vmem:[#allocation7 + $0x140] sm:$0xff]  ;;  %v4485_v50 = vcombine.low %v298_v39, %v302_v40 }
  0x69   :  { %v310_v48 = vld [vmem:[#allocation7 + $0x160] sm:$0xff]  ;;  %v4488_v51 = vcombine.high %v299_v45, %v303_v46  ;;  %v307_v52 = vld [vmem:[#allocation7 + $0x148] sm:$0xff]  ;;  %v4487_v57 = vcombine.low %v299_v45, %v303_v46 }
  0x6a   :  { %1847 = vmatpush1.bf16.msra.mxu0 %v4461_v26  ;;  %1929 = vmatpush1.bf16.msra.mxu1 %v4463_v33  ;;  %v311_v53 = vld [vmem:[#allocation7 + $0x168] sm:$0xff]  ;;  %v4494_v54 = vcombine.high %v306_v47, %v310_v48  ;;  %v314_v55 = vld [vmem:[#allocation7 + $0x180] sm:$0xff]  ;;  %v4493_v60 = vcombine.low %v306_v47, %v310_v48 }
  0x6b   :  { %1848 = vmatprep.subr.bf16.mxu0 %v4470_v28  ;;  %1930 = vmatprep.subr.bf16.mxu1 %v4472_v35  ;;  %v318_v56 = vld [vmem:[#allocation7 + $0x1a0] sm:$0xff]  ;;  %v315_v58 = vld [vmem:[#allocation7 + $0x188] sm:$0xff]  ;;  %v4496_v61 = vcombine.high %v307_v52, %v311_v53  ;;  %v4495_v1 = vcombine.low %v307_v52, %v311_v53 }
  0x6c   :  { %v319_v59 = vld [vmem:[#allocation7 + $0x1a8] sm:$0xff]  ;;  %v322_v62 = vld [vmem:[#allocation7 + $0x1c0] sm:$0xff]  ;;  %v4502_v0 = vcombine.high %v314_v55, %v318_v56  ;;  %v4501_v4 = vcombine.low %v314_v55, %v318_v56 }
  0x6d   :  { %v326_v63 = vld [vmem:[#allocation7 + $0x1e0] sm:$0xff]  ;;  %v323_v2 = vld [vmem:[#allocation7 + $0x1c8] sm:$0xff]  ;;  %v4504_v5 = vcombine.high %v315_v58, %v319_v59  ;;  %v4503_v9 = vcombine.low %v315_v58, %v319_v59 }
  0x6e   :  { %1849 = vmatpush1.bf16.msra.mxu0 %v4469_v34  ;;  %1931 = vmatpush1.bf16.msra.mxu1 %v4471_v41  ;;  %v327_v3 = vld [vmem:[#allocation7 + $0x1e8] sm:$0xff]  ;;  %v330_v6 = vld [vmem:[#allocation7 + $0x200] sm:$0xff]  ;;  %v4510_v8 = vcombine.high %v322_v62, %v326_v63  ;;  %v4509_v12 = vcombine.low %v322_v62, %v326_v63 }
  0x6f   :  { %1850 = vmatprep.subr.bf16.mxu0 %v4478_v36  ;;  %1932 = vmatprep.subr.bf16.mxu1 %v4480_v43  ;;  %v334_v7 = vld [vmem:[#allocation7 + $0x220] sm:$0xff]  ;;  %v331_v10 = vld [vmem:[#allocation7 + $0x208] sm:$0xff]  ;;  %v4512_v13 = vcombine.high %v323_v2, %v327_v3  ;;  %v4511_v17 = vcombine.low %v323_v2, %v327_v3 }
  0x70   :  { %v335_v11 = vld [vmem:[#allocation7 + $0x228] sm:$0xff]  ;;  %v338_v14 = vld [vmem:[#allocation7 + $0x240] sm:$0xff]  ;;  %v4518_v16 = vcombine.high %v330_v6, %v334_v7  ;;  %v4517_v20 = vcombine.low %v330_v6, %v334_v7 }
  0x71   :  { %v342_v15 = vld [vmem:[#allocation7 + $0x260] sm:$0xff]  ;;  %v339_v18 = vld [vmem:[#allocation7 + $0x248] sm:$0xff]  ;;  %v4520_v21 = vcombine.high %v331_v10, %v335_v11  ;;  %v4519_v25 = vcombine.low %v331_v10, %v335_v11 }
  0x72   :  { %1851 = vmatpush1.bf16.msra.mxu0 %v4477_v42  ;;  %1933 = vmatpush1.bf16.msra.mxu1 %v4479_v49  ;;  %v343_v19 = vld [vmem:[#allocation7 + $0x268] sm:$0xff]  ;;  %v346_v22 = vld [vmem:[#allocation7 + $0x280] sm:$0xff]  ;;  %v4526_v24 = vcombine.high %v338_v14, %v342_v15  ;;  %v4525_v28 = vcombine.low %v338_v14, %v342_v15 }
  0x73   :  { %1852 = vmatprep.subr.bf16.mxu0 %v4486_v44  ;;  %1934 = vmatprep.subr.bf16.mxu1 %v4488_v51  ;;  %v350_v23 = vld [vmem:[#allocation7 + $0x2a0] sm:$0xff]  ;;  %v347_v26 = vld [vmem:[#allocation7 + $0x288] sm:$0xff]  ;;  %v4528_v29 = vcombine.high %v339_v18, %v343_v19  ;;  %v4527_v33 = vcombine.low %v339_v18, %v343_v19  ;;  %v112_v19 = vlaneseq }
  0x74   :  { %v351_v27 = vld [vmem:[#allocation7 + $0x2a8] sm:$0xff]  ;;  %v354_v30 = vld [vmem:[#allocation7 + $0x2c0] sm:$0xff]  ;;  %v4534_v32 = vcombine.high %v346_v22, %v350_v23  ;;  %v4533_v36 = vcombine.low %v346_v22, %v350_v23  ;;  %v5808_v22 = vld [vmem:[%s5905_s2] sm:$0xf] }
  0x75   :  { %v358_v31 = vld [vmem:[#allocation7 + $0x2e0] sm:$0xff]  ;;  %v355_v34 = vld [vmem:[#allocation7 + $0x2c8] sm:$0xff]  ;;  %v4536_v37 = vcombine.high %v347_v26, %v351_v27  ;;  %v4535_v41 = vcombine.low %v347_v26, %v351_v27 }
  0x76   :  { %1853 = vmatpush1.bf16.msra.mxu0 %v4485_v50  ;;  %1935 = vmatpush1.bf16.msra.mxu1 %v4487_v57  ;;  %v359_v35 = vld [vmem:[#allocation7 + $0x2e8] sm:$0xff]  ;;  %v362_v38 = vld [vmem:[#allocation7 + $0x300] sm:$0xff]  ;;  %v4542_v40 = vcombine.high %v354_v30, %v358_v31  ;;  %v4541_v44 = vcombine.low %v354_v30, %v358_v31 }
  0x77   :  { %1854 = vmatprep.subr.bf16.mxu0 %v4494_v54  ;;  %1936 = vmatprep.subr.bf16.mxu1 %v4496_v61  ;;  %v366_v39 = vld [vmem:[#allocation7 + $0x320] sm:$0xff]  ;;  %v363_v42 = vld [vmem:[#allocation7 + $0x308] sm:$0xff]  ;;  %v4544_v45 = vcombine.high %v355_v34, %v359_v35  ;;  %v4543_v49 = vcombine.low %v355_v34, %v359_v35 }
  0x78   :  { %v367_v43 = vld [vmem:[#allocation7 + $0x328] sm:$0xff]  ;;  %v370_v46 = vld [vmem:[#allocation7 + $0x340] sm:$0xff]  ;;  %v4550_v48 = vcombine.high %v362_v38, %v366_v39  ;;  %v4549_v52 = vcombine.low %v362_v38, %v366_v39 }
  0x79   :  { %v374_v47 = vld [vmem:[#allocation7 + $0x360] sm:$0xff]  ;;  %v371_v50 = vld [vmem:[#allocation7 + $0x348] sm:$0xff]  ;;  %v4552_v53 = vcombine.high %v363_v42, %v367_v43  ;;  %v4551_v55 = vcombine.low %v363_v42, %v367_v43 }
  0x7a   :  { %1855 = vmatpush1.bf16.msra.mxu0 %v4493_v60  ;;  %1937 = vmatpush1.bf16.msra.mxu1 %v4495_v1  ;;  %v375_v51 = vld [vmem:[#allocation7 + $0x368] sm:$0xff]  ;;  %v4558_v54 = vcombine.high %v370_v46, %v374_v47  ;;  %v4557_v56 = vcombine.low %v370_v46, %v374_v47  ;;  %v378_v59 = vld [vmem:[#allocation7 + $0x380] sm:$0xff] }
  0x7b   :  { %1856 = vmatprep.subr.bf16.mxu0 %v4502_v0  ;;  %1938 = vmatprep.subr.bf16.mxu1 %v4504_v5  ;;  %v4560_v57 = vcombine.high %v371_v50, %v375_v51  ;;  %v4559_v58 = vcombine.low %v371_v50, %v375_v51  ;;  %v382_v60 = vld [vmem:[#allocation7 + $0x3a0] sm:$0xff]  ;;  %v379_v61 = vld [vmem:[#allocation7 + $0x388] sm:$0xff] }
  0x7c   :  { %v4566_v62 = vcombine.high %v378_v59, %v382_v60  ;;  %v383_v63 = vld [vmem:[#allocation7 + $0x3a8] sm:$0xff]  ;;  %v4565_v0 = vcombine.low %v378_v59, %v382_v60  ;;  %v386_v3 = vld [vmem:[#allocation7 + $0x3c0] sm:$0xff] }
  0x7d   :  { %v4567_v1 = vcombine.low %v379_v61, %v383_v63  ;;  %v4568_v2 = vcombine.high %v379_v61, %v383_v63  ;;  %v387_v5 = vld [vmem:[#allocation7 + $0x3c8] sm:$0xff]  ;;  %v394_v11 = vld [vmem:[#allocation7 + $0x400] sm:$0xff] }
  0x7e   :  { %1857 = vmatpush1.bf16.msra.mxu0 %v4501_v4  ;;  %1939 = vmatpush1.bf16.msra.mxu1 %v4503_v9  ;;  %v390_v4 = vld [vmem:[#allocation7 + $0x3e0] sm:$0xff]  ;;  %v391_v7 = vld [vmem:[#allocation7 + $0x3e8] sm:$0xff] }
  0x7f   :  { %1858 = vmatprep.subr.bf16.mxu0 %v4510_v8  ;;  %1940 = vmatprep.subr.bf16.mxu1 %v4512_v13  ;;  %v4574_v6 = vcombine.high %v386_v3, %v390_v4  ;;  %v4573_v8 = vcombine.low %v386_v3, %v390_v4  ;;  %v4575_v9 = vcombine.low %v387_v5, %v391_v7  ;;  %v395_v13 = vld [vmem:[#allocation7 + $0x408] sm:$0xff]  ;;  %v402_v35 = vld [vmem:[#allocation7 + $0x440] sm:$0xff] }
  0x80   :  { %v4576_v10 = vcombine.high %v387_v5, %v391_v7  ;;  %v399_v15 = vld [vmem:[#allocation7 + $0x428] sm:$0xff]  ;;  %v406_v38 = vld [vmem:[#allocation7 + $0x460] sm:$0xff] }
  0x81   :  { %v4584_v18 = vcombine.high %v395_v13, %v399_v15  ;;  %v403_v39 = vld [vmem:[#allocation7 + $0x448] sm:$0xff]  ;;  %v4590_v47 = vcombine.high %v402_v35, %v406_v38  ;;  %v414_v51 = vld [vmem:[#allocation7 + $0x4a0] sm:$0xff] }
  0x82   :  { %1859 = vmatpush1.bf16.msra.mxu0 %v4509_v12  ;;  %1941 = vmatpush1.bf16.msra.mxu1 %v4511_v17  ;;  %v398_v12 = vld [vmem:[#allocation7 + $0x420] sm:$0xff]  ;;  %v4583_v17 = vcombine.low %v395_v13, %v399_v15  ;;  %v419_v61 = vld [vmem:[#allocation7 + $0x4c8] sm:$0xff] }
  0x83   :  { %1860 = vmatprep.subr.bf16.mxu0 %v4518_v16  ;;  %1942 = vmatprep.subr.bf16.mxu1 %v4520_v21  ;;  %v4582_v14 = vcombine.high %v394_v11, %v398_v12  ;;  %v4581_v16 = vcombine.low %v394_v11, %v398_v12  ;;  %v418_v59 = vld [vmem:[#allocation7 + $0x4c0] sm:$0xff]  ;;  %v427_v5 = vld [vmem:[#allocation7 + $0x508] sm:$0xff] }
  0x84   :  { %v422_v60 = vld [vmem:[#allocation7 + $0x4e0] sm:$0xff]  ;;  %v435_v13 = vld [vmem:[#allocation7 + $0x548] sm:$0xff] }
  0x85   :  { %v426_v3 = vld [vmem:[#allocation7 + $0x500] sm:$0xff]  ;;  %v4605_v7 = vcombine.low %v418_v59, %v422_v60 }
  0x86   :  { %1861 = vmatpush1.bf16.msra.mxu0 %v4517_v20  ;;  %1943 = vmatpush1.bf16.msra.mxu1 %v4519_v25  ;;  %v5800_v20 = vshrl.u32 %v112_v19, 7  ;;  %v430_v4 = vld [vmem:[#allocation7 + $0x520] sm:$0xff] }
  0x87   :  { %1862 = vmatprep.subr.bf16.mxu0 %v4526_v24  ;;  %1944 = vmatprep.subr.bf16.mxu1 %v4528_v29  ;;  %v434_v11 = vld [vmem:[#allocation7 + $0x540] sm:$0xff]  ;;  %v4613_v15 = vcombine.low %v426_v3, %v430_v4 }
  0x88   :  { %v5803_v21 = vsub.s32 0, %v5800_v20  ;;  %v5811_v23 = vsub.s32 1, %v5800_v20  ;;  %v5816_v25 = vsub.s32 3, %v5800_v20  ;;  %v438_v12 = vld [vmem:[#allocation7 + $0x560] sm:$0xff] }
  0x89   :  { %v442_v19 = vld [vmem:[#allocation7 + $0x580] sm:$0xff] }
  0x8a   :  { %1863 = vmatpush1.bf16.msra.mxu0 %v4525_v28  ;;  %1945 = vmatpush1.bf16.msra.mxu1 %v4527_v33  ;;  %v115_v24 = vrot.slane %v5808_v22, %v5803_v21  ;;  %v119_v26 = vrot.slane %v5808_v22, %v5811_v23  ;;  %v127_v30 = vrot.slane %v5808_v22, %v5816_v25 }
  0x8b   :  { %1864 = vmatprep.subr.bf16.mxu0 %v4534_v32  ;;  %1946 = vmatprep.subr.bf16.mxu1 %v4536_v37 }
  0x8e   :  { %1865 = vmatpush1.bf16.msra.mxu0 %v4533_v36  ;;  %1947 = vmatpush1.bf16.msra.mxu1 %v4535_v41 }
  0x8f   :  { %1866 = vmatprep.subr.bf16.mxu0 %v4542_v40  ;;  %1948 = vmatprep.subr.bf16.mxu1 %v4544_v45  ;;  %v407_v40 = vld [vmem:[#allocation7 + $0x468] sm:$0xff] }
  0x92   :  { %1867 = vmatpush1.bf16.msra.mxu0 %v4541_v44  ;;  %1949 = vmatpush1.bf16.msra.mxu1 %v4543_v49  ;;  %v410_v49 = vld [vmem:[#allocation7 + $0x480] sm:$0xff] }
  0x93   :  { %1868 = vmatprep.subr.bf16.mxu0 %v4550_v48  ;;  %1950 = vmatprep.subr.bf16.mxu1 %v4552_v53  ;;  %v4592_v48 = vcombine.high %v403_v39, %v407_v40  ;;  %v415_v53 = vld [vmem:[#allocation7 + $0x4a8] sm:$0xff]  ;;  %v4597_v63 = vcombine.low %v410_v49, %v414_v51 }
  0x96   :  { %1869 = vmatpush1.bf16.msra.mxu0 %v4549_v52  ;;  %1951 = vmatpush1.bf16.msra.mxu1 %v4551_v55  ;;  %v411_v52 = vld [vmem:[#allocation7 + $0x488] sm:$0xff]  ;;  %v4589_v55 = vcombine.low %v402_v35, %v406_v38 }
  0x97   :  { %1870 = vmatprep.subr.bf16.mxu0 %v4558_v54  ;;  %1952 = vmatprep.subr.bf16.mxu1 %v4560_v57  ;;  %v4598_v57 = vcombine.high %v410_v49, %v414_v51  ;;  %v455_v35 = vld [vmem:[#allocation7 + $0x5e8] sm:$0xff]  ;;  %v466_v51 = vld [vmem:[#allocation7 + $0x640] sm:$0xff] }
  0x9a   :  { %1871 = vmatpush1.bf16.msra.mxu0 %v4557_v56  ;;  %1953 = vmatpush1.bf16.msra.mxu1 %v4559_v58  ;;  %v4591_v56 = vcombine.low %v403_v39, %v407_v40  ;;  %v4600_v58 = vcombine.high %v411_v52, %v415_v53 }
  0x9b   :  { %1872 = vmatprep.subr.bf16.mxu0 %v4566_v62  ;;  %1954 = vmatprep.subr.bf16.mxu1 %v4568_v2  ;;  %v423_v62 = vld [vmem:[#allocation7 + $0x4e8] sm:$0xff] }
  0x9c   :  { %v4608_v2 = vcombine.high %v419_v61, %v423_v62 }
  0x9e   :  { %1873 = vmatpush1.bf16.msra.mxu0 %v4565_v0  ;;  %1955 = vmatpush1.bf16.msra.mxu1 %v4567_v1  ;;  %v4599_v0 = vcombine.low %v411_v52, %v415_v53  ;;  %v4606_v1 = vcombine.high %v418_v59, %v422_v60  ;;  %v470_v52 = vld [vmem:[#allocation7 + $0x660] sm:$0xff]  ;;  %v467_v53 = vld [vmem:[#allocation7 + $0x648] sm:$0xff] }
  0x9f   :  { %1874 = vmatprep.subr.bf16.mxu0 %v4574_v6  ;;  %1956 = vmatprep.subr.bf16.mxu1 %v4576_v10  ;;  %v431_v6 = vld [vmem:[#allocation7 + $0x528] sm:$0xff]  ;;  %v474_v60 = vld [vmem:[#allocation7 + $0x680] sm:$0xff] }
  0xa0   :  { %v4616_v10 = vcombine.high %v427_v5, %v431_v6 }
  0xa2   :  { %1875 = vmatpush1.bf16.msra.mxu0 %v4573_v8  ;;  %1957 = vmatpush1.bf16.msra.mxu1 %v4575_v9  ;;  %v4607_v8 = vcombine.low %v419_v61, %v423_v62  ;;  %v4614_v9 = vcombine.high %v426_v3, %v430_v4  ;;  %v478_v61 = vld [vmem:[#allocation7 + $0x6a0] sm:$0xff]  ;;  %v475_v62 = vld [vmem:[#allocation7 + $0x688] sm:$0xff] }
  0xa3   :  { %1885 = vmatprep.subr.bf16.mxu0 %v4582_v14  ;;  %1967 = vmatprep.subr.bf16.mxu1 %v4584_v18  ;;  %v439_v14 = vld [vmem:[#allocation7 + $0x568] sm:$0xff]  ;;  %v482_v4 = vld [vmem:[#allocation7 + $0x6c0] sm:$0xff] }
  0xa4   :  { %v4624_v18 = vcombine.high %v435_v13, %v439_v14 }
 0x138   :  { %v210_v27 = vpop.f32.mrb[0].mxu0  ;;  %v5822_v36 = vpop.f32.mrb[0].mxu1 }
 0x139   :  { %v211_v28 = vadd.f32 %v210_v27, %v115_v24  ;;  %v212_v29 = vpop.f32.mrb[1].mxu0  ;;  %v253_v41 = vpop.f32.mrb[1].mxu1  ;;  %v446_v24 = vld [vmem:[#allocation7 + $0x5a0] sm:$0xff]  ;;  %v447_v27 = vld [vmem:[#allocation7 + $0x5a8] sm:$0xff] }
 0x13a   :  { %v213_v31 = vadd.f32 %v212_v29, %v119_v26  ;;  %v214_v32 = vpop.f32.mrb[2].mxu0  ;;  %v254_v42 = vadd.f32 %v253_v41, %v127_v30  ;;  %v255_v43 = vpop.f32.mrb[2].mxu1  ;;  %v443_v26 = vld [vmem:[#allocation7 + $0x588] sm:$0xff]  ;;  %v4623_v29 = vcombine.low %v435_v13, %v439_v14  ;;  %v4630_v30 = vcombine.high %v442_v19, %v446_v24  ;;  %v458_v41 = vld [vmem:[#allocation7 + $0x600] sm:$0xff] }
 0x13b   :  { %v258_v33 = vmax.f32 %v211_v28, 0.0  ;;  %v215_v34 = vpop.f32.mrb[3].mxu0  ;;  %v256_v45 = vpop.f32.mrb[3].mxu1  ;;  %v4621_v28 = vcombine.low %v434_v11, %v438_v12  ;;  %v450_v32 = vld [vmem:[#allocation7 + $0x5c0] sm:$0xff]  ;;  %v4631_v38 = vcombine.low %v443_v26, %v447_v27  ;;  %v459_v43 = vld [vmem:[#allocation7 + $0x608] sm:$0xff] }
 0x13c   :  { %v259_v37 = vmax.f32 %v213_v31, 0.0  ;;  %v261_v50 = vmax.f32 %v254_v42, 0.0  ;;  %v4632_v31 = vcombine.high %v443_v26, %v447_v27  ;;  %v451_v34 = vld [vmem:[#allocation7 + $0x5c8] sm:$0xff]  ;;  %v462_v42 = vld [vmem:[#allocation7 + $0x620] sm:$0xff] }
 0x13d   :  { %v5826_v46 = vpack.c.bf16 %v258_v33, %v258_v33  ;;  %v454_v33 = vld [vmem:[#allocation7 + $0x5e0] sm:$0xff]  ;;  %v4640_v40 = vcombine.high %v451_v34, %v455_v35  ;;  %v463_v45 = vld [vmem:[#allocation7 + $0x628] sm:$0xff]  ;;  %v4646_v49 = vcombine.high %v458_v41, %v462_v42 }
 0x13e   :  { %v5824_v44 = vpack.c.bf16 %v259_v37, %v259_v37  ;;  %v5832_v54 = vpack.c.bf16 %v261_v50, %v261_v50  ;;  %v4629_v37 = vcombine.low %v442_v19, %v446_v24  ;;  %v4638_v39 = vcombine.high %v450_v32, %v454_v33  ;;  %v494_v13 = vld [vmem:[#allocation7 + $0x720] sm:$0xff]  ;;  %v491_v14 = vld [vmem:[#allocation7 + $0x708] sm:$0xff] }
 0x13f   :  { %v4648_v50 = vcombine.high %v459_v43, %v463_v45  ;;  %v498_v24 = vld [vmem:[#allocation7 + $0x740] sm:$0xff]  ;;  %v499_v27 = vld [vmem:[#allocation7 + $0x748] sm:$0xff] }
 0x140   :  { %1876 = vmatprep.mubr.bf16.mxu0 %v5824_v44  ;;  %1958 = vmatprep.mubr.bf16.mxu1 %v5824_v44  ;;  %v502_v26 = vld [vmem:[#allocation7 + $0x760] sm:$0xff] }
 0x141   :  { %1877 = vmatmul.mubr.bf16.vlgmr.msra.gmra.mrb[4].mxu0 %v5826_v46  ;;  %1959 = vmatmul.mubr.bf16.vlgmr.msra.gmra.mrb[4].mxu1 %v5826_v46 }
 0x142   :  { %1886 = vmatpush1.bf16.msra.mxu0 %v4581_v16  ;;  %1968 = vmatpush1.bf16.msra.mxu1 %v4583_v17  ;;  %v4615_v16 = vcombine.low %v427_v5, %v431_v6  ;;  %v4622_v17 = vcombine.high %v434_v11, %v438_v12  ;;  %v486_v5 = vld [vmem:[#allocation7 + $0x6e0] sm:$0xff]  ;;  %v483_v6 = vld [vmem:[#allocation7 + $0x6c8] sm:$0xff] }
 0x143   :  { %1887 = vmatprep.subr.bf16.mxu0 %v4590_v47  ;;  %1969 = vmatprep.subr.bf16.mxu1 %v4592_v48  ;;  %v4637_v47 = vcombine.low %v450_v32, %v454_v33  ;;  %v4639_v48 = vcombine.low %v451_v34, %v455_v35  ;;  %v490_v12 = vld [vmem:[#allocation7 + $0x700] sm:$0xff]  ;;  %v4686_v32 = vcombine.high %v498_v24, %v502_v26 }
 0x144   :  { %1917 = vmatprep.mubr.bf16.mxu0 %v5832_v54  ;;  %1999 = vmatprep.mubr.bf16.mxu1 %v5832_v54  ;;  %v506_v34 = vld [vmem:[#allocation7 + $0x780] sm:$0xff] }
 0x145   :  { %v510_v35 = vld [vmem:[#allocation7 + $0x7a0] sm:$0xff] }
 0x146   :  { %1888 = vmatpush1.bf16.msra.mxu0 %v4589_v55  ;;  %1970 = vmatpush1.bf16.msra.mxu1 %v4591_v56  ;;  %v471_v55 = vld [vmem:[#allocation7 + $0x668] sm:$0xff]  ;;  %v4645_v56 = vcombine.low %v458_v41, %v462_v42  ;;  %v4694_v42 = vcombine.high %v506_v34, %v510_v35 }
 0x147   :  { %1889 = vmatprep.subr.bf16.mxu0 %v4598_v57  ;;  %1971 = vmatprep.subr.bf16.mxu1 %v4600_v58  ;;  %v4647_v57 = vcombine.low %v459_v43, %v463_v45  ;;  %v4654_v58 = vcombine.high %v466_v51, %v470_v52  ;;  %v4656_v59 = vcombine.high %v467_v53, %v471_v55  ;;  %v514_v45 = vld [vmem:[#allocation7 + $0x7c0] sm:$0xff] }
 0x14a   :  { %1890 = vmatpush1.bf16.msra.mxu0 %v4597_v63  ;;  %1972 = vmatpush1.bf16.msra.mxu1 %v4599_v0  ;;  %v479_v63 = vld [vmem:[#allocation7 + $0x6a8] sm:$0xff]  ;;  %v4653_v0 = vcombine.low %v466_v51, %v470_v52 }
 0x14b   :  { %1891 = vmatprep.subr.bf16.mxu0 %v4606_v1  ;;  %1973 = vmatprep.subr.bf16.mxu1 %v4608_v2  ;;  %v4655_v1 = vcombine.low %v467_v53, %v471_v55  ;;  %v4662_v2 = vcombine.high %v474_v60, %v478_v61  ;;  %v4664_v3 = vcombine.high %v475_v62, %v479_v63 }
 0x14e   :  { %1892 = vmatpush1.bf16.msra.mxu0 %v4605_v7  ;;  %1974 = vmatpush1.bf16.msra.mxu1 %v4607_v8  ;;  %v487_v7 = vld [vmem:[#allocation7 + $0x6e8] sm:$0xff]  ;;  %v4661_v8 = vcombine.low %v474_v60, %v478_v61 }
 0x14f   :  { %1893 = vmatprep.subr.bf16.mxu0 %v4614_v9  ;;  %1975 = vmatprep.subr.bf16.mxu1 %v4616_v10  ;;  %v4663_v9 = vcombine.low %v475_v62, %v479_v63  ;;  %v4670_v10 = vcombine.high %v482_v4, %v486_v5  ;;  %v4672_v11 = vcombine.high %v483_v6, %v487_v7 }
 0x152   :  { %1894 = vmatpush1.bf16.msra.mxu0 %v4613_v15  ;;  %1976 = vmatpush1.bf16.msra.mxu1 %v4615_v16  ;;  %v495_v15 = vld [vmem:[#allocation7 + $0x728] sm:$0xff]  ;;  %v4669_v16 = vcombine.low %v482_v4, %v486_v5 }
 0x153   :  { %1895 = vmatprep.subr.bf16.mxu0 %v4622_v17  ;;  %1977 = vmatprep.subr.bf16.mxu1 %v4624_v18  ;;  %v4671_v17 = vcombine.low %v483_v6, %v487_v7  ;;  %v4678_v18 = vcombine.high %v490_v12, %v494_v13  ;;  %v4680_v19 = vcombine.high %v491_v14, %v495_v15 }
 0x156   :  { %1896 = vmatpush1.bf16.msra.mxu0 %v4621_v28  ;;  %1978 = vmatpush1.bf16.msra.mxu1 %v4623_v29  ;;  %v503_v28 = vld [vmem:[#allocation7 + $0x768] sm:$0xff]  ;;  %v4677_v29 = vcombine.low %v490_v12, %v494_v13 }
 0x157   :  { %1897 = vmatprep.subr.bf16.mxu0 %v4630_v30  ;;  %1979 = vmatprep.subr.bf16.mxu1 %v4632_v31  ;;  %v4679_v30 = vcombine.low %v491_v14, %v495_v15  ;;  %v5837_v31 = vsub.s32 2, %v5800_v20  ;;  %v4688_v33 = vcombine.high %v499_v27, %v503_v28 }
 0x159   :  { %v123_v41 = vrot.slane %v5808_v22, %v5837_v31  ;;  %v272_v22 = vld [vmem:[#allocation7 + $0x30] sm:$0xff] }
 0x15a   :  { %1898 = vmatpush1.bf16.msra.mxu0 %v4629_v37  ;;  %1980 = vmatpush1.bf16.msra.mxu1 %v4631_v38  ;;  %v507_v37 = vld [vmem:[#allocation7 + $0x788] sm:$0xff] }
 0x15b   :  { %1899 = vmatprep.subr.bf16.mxu0 %v4638_v39  ;;  %1981 = vmatprep.subr.bf16.mxu1 %v4640_v40  ;;  %v511_v38 = vld [vmem:[#allocation7 + $0x7a8] sm:$0xff]  ;;  %v4685_v39 = vcombine.low %v498_v24, %v502_v26  ;;  %v4687_v40 = vcombine.low %v499_v27, %v503_v28  ;;  %v252_v52 = vadd.f32 %v5822_v36, %v123_v41  ;;  %v277_v36 = vld [vmem:[#allocation7 + $0x58] sm:$0xff] }
 0x15c   :  { %v4696_v43 = vcombine.high %v507_v37, %v511_v38  ;;  %v4695_v51 = vcombine.low %v507_v37, %v511_v38  ;;  %v308_v38 = vld [vmem:[#allocation7 + $0x150] sm:$0xff]  ;;  %v313_v41 = vld [vmem:[#allocation7 + $0x178] sm:$0xff] }
 0x15d   :  { %v260_v61 = vmax.f32 %v252_v52, 0.0 }
 0x15e   :  { %1900 = vmatpush1.bf16.msra.mxu0 %v4637_v47  ;;  %1982 = vmatpush1.bf16.msra.mxu1 %v4639_v48  ;;  %v518_v47 = vld [vmem:[#allocation7 + $0x7e0] sm:$0xff]  ;;  %v515_v48 = vld [vmem:[#allocation7 + $0x7c8] sm:$0xff] }
 0x15f   :  { %1901 = vmatprep.subr.bf16.mxu0 %v4646_v49  ;;  %1983 = vmatprep.subr.bf16.mxu1 %v4648_v50  ;;  %v519_v49 = vld [vmem:[#allocation7 + $0x7e8] sm:$0xff]  ;;  %v4693_v50 = vcombine.low %v506_v34, %v510_v35  ;;  %v4702_v53 = vcombine.high %v514_v45, %v518_v47  ;;  %v5842_v4 = vpack.c.bf16 %v260_v61, %v260_v61 }
 0x160   :  { %v4704_v55 = vcombine.high %v515_v48, %v519_v49  ;;  %v4703_v60 = vcombine.low %v515_v48, %v519_v49  ;;  %v316_v48 = vld [vmem:[#allocation7 + $0x190] sm:$0xff] }
 0x161   :  { %v320_v49 = vld [vmem:[#allocation7 + $0x1b0] sm:$0xff] }
 0x162   :  { %1902 = vmatpush1.bf16.msra.mxu0 %v4645_v56  ;;  %1984 = vmatpush1.bf16.msra.mxu1 %v4647_v57  ;;  %v268_v56 = vld [vmem:[#allocation7 + $0x10] sm:$0xff]  ;;  %v269_v57 = vld [vmem:[#allocation7 + $0x18] sm:$0xff] }
 0x163   :  { %1903 = vmatprep.subr.bf16.mxu0 %v4654_v58  ;;  %1985 = vmatprep.subr.bf16.mxu1 %v4656_v59  ;;  %v273_v58 = vld [vmem:[#allocation7 + $0x38] sm:$0xff]  ;;  %v4701_v59 = vcombine.low %v514_v45, %v518_v47  ;;  %v4458_v62 = vcombine.high %v268_v56, %v272_v22 }
 0x164   :  { %v4460_v63 = vcombine.high %v269_v57, %v273_v58  ;;  %v4459_v5 = vcombine.low %v269_v57, %v273_v58  ;;  %v328_v57 = vld [vmem:[#allocation7 + $0x1f0] sm:$0xff]  ;;  %v325_v58 = vld [vmem:[#allocation7 + $0x1d8] sm:$0xff] }
 0x166   :  { %1904 = vmatpush1.bf16.msra.mxu0 %v4653_v0  ;;  %1986 = vmatpush1.bf16.msra.mxu1 %v4655_v1  ;;  %v276_v0 = vld [vmem:[#allocation7 + $0x50] sm:$0xff] }
 0x167   :  { %1905 = vmatprep.subr.bf16.mxu0 %v4662_v2  ;;  %1987 = vmatprep.subr.bf16.mxu1 %v4664_v3  ;;  %v280_v1 = vld [vmem:[#allocation7 + $0x70] sm:$0xff]  ;;  %v281_v2 = vld [vmem:[#allocation7 + $0x78] sm:$0xff]  ;;  %v4457_v3 = vcombine.low %v268_v56, %v272_v22 }
 0x168   :  { %v4466_v6 = vcombine.high %v276_v0, %v280_v1  ;;  %v4468_v7 = vcombine.high %v277_v36, %v281_v2  ;;  %v4465_v12 = vcombine.low %v276_v0, %v280_v1  ;;  %v4467_v13 = vcombine.low %v277_v36, %v281_v2  ;;  %v324_v22 = vld [vmem:[#allocation7 + $0x1d0] sm:$0xff]  ;;  %v333_v36 = vld [vmem:[#allocation7 + $0x218] sm:$0xff] }
 0x169   :  { %v332_v0 = vld [vmem:[#allocation7 + $0x210] sm:$0xff]  ;;  %v337_v2 = vld [vmem:[#allocation7 + $0x238] sm:$0xff] }
 0x16a   :  { %1906 = vmatpush1.bf16.msra.mxu0 %v4661_v8  ;;  %1988 = vmatpush1.bf16.msra.mxu1 %v4663_v9  ;;  %v284_v8 = vld [vmem:[#allocation7 + $0x90] sm:$0xff] }
 0x16b   :  { %1907 = vmatprep.subr.bf16.mxu0 %v4670_v10  ;;  %1989 = vmatprep.subr.bf16.mxu1 %v4672_v11  ;;  %v288_v9 = vld [vmem:[#allocation7 + $0xb0] sm:$0xff]  ;;  %v285_v10 = vld [vmem:[#allocation7 + $0x98] sm:$0xff] }
 0x16c   :  { %v289_v11 = vld [vmem:[#allocation7 + $0xb8] sm:$0xff]  ;;  %v4474_v14 = vcombine.high %v284_v8, %v288_v9  ;;  %v4473_v24 = vcombine.low %v284_v8, %v288_v9  ;;  %v336_v1 = vld [vmem:[#allocation7 + $0x230] sm:$0xff] }
 0x16d   :  { %v4476_v15 = vcombine.high %v285_v10, %v289_v11  ;;  %v4475_v26 = vcombine.low %v285_v10, %v289_v11  ;;  %v340_v8 = vld [vmem:[#allocation7 + $0x250] sm:$0xff]  ;;  %v341_v10 = vld [vmem:[#allocation7 + $0x258] sm:$0xff] }
 0x16e   :  { %1908 = vmatpush1.bf16.msra.mxu0 %v4669_v16  ;;  %1990 = vmatpush1.bf16.msra.mxu1 %v4671_v17  ;;  %v292_v16 = vld [vmem:[#allocation7 + $0xd0] sm:$0xff]  ;;  %v345_v11 = vld [vmem:[#allocation7 + $0x278] sm:$0xff] }
 0x16f   :  { %1909 = vmatprep.subr.bf16.mxu0 %v4678_v18  ;;  %1991 = vmatprep.subr.bf16.mxu1 %v4680_v19  ;;  %v296_v17 = vld [vmem:[#allocation7 + $0xf0] sm:$0xff]  ;;  %v293_v18 = vld [vmem:[#allocation7 + $0xd8] sm:$0xff] }
 0x170   :  { %v297_v19 = vld [vmem:[#allocation7 + $0xf8] sm:$0xff]  ;;  %v4482_v27 = vcombine.high %v292_v16, %v296_v17  ;;  %v344_v9 = vld [vmem:[#allocation7 + $0x270] sm:$0xff] }
 0x171   :  { %v4484_v28 = vcombine.high %v293_v18, %v297_v19  ;;  %v4483_v34 = vcombine.low %v293_v18, %v297_v19  ;;  %v349_v18 = vld [vmem:[#allocation7 + $0x298] sm:$0xff] }
 0x172   :  { %1910 = vmatpush1.bf16.msra.mxu0 %v4677_v29  ;;  %1992 = vmatpush1.bf16.msra.mxu1 %v4679_v30  ;;  %v300_v29 = vld [vmem:[#allocation7 + $0x110] sm:$0xff]  ;;  %v353_v19 = vld [vmem:[#allocation7 + $0x2b8] sm:$0xff] }
 0x173   :  { %1911 = vmatprep.subr.bf16.mxu0 %v4686_v32  ;;  %1993 = vmatprep.subr.bf16.mxu1 %v4688_v33  ;;  %v304_v30 = vld [vmem:[#allocation7 + $0x130] sm:$0xff]  ;;  %v305_v32 = vld [vmem:[#allocation7 + $0x138] sm:$0xff]  ;;  %v4481_v33 = vcombine.low %v292_v16, %v296_v17 }
 0x174   :  { %v4490_v35 = vcombine.high %v300_v29, %v304_v30  ;;  %v348_v16 = vld [vmem:[#allocation7 + $0x290] sm:$0xff] }
 0x175   :  { %v352_v17 = vld [vmem:[#allocation7 + $0x2b0] sm:$0xff] }
 0x176   :  { %1912 = vmatpush1.bf16.msra.mxu0 %v4685_v39  ;;  %1994 = vmatpush1.bf16.msra.mxu1 %v4687_v40  ;;  %v312_v39 = vld [vmem:[#allocation7 + $0x170] sm:$0xff]  ;;  %v309_v40 = vld [vmem:[#allocation7 + $0x158] sm:$0xff] }
 0x177   :  { %1913 = vmatprep.subr.bf16.mxu0 %v4694_v42  ;;  %1995 = vmatprep.subr.bf16.mxu1 %v4696_v43  ;;  %v4489_v42 = vcombine.low %v300_v29, %v304_v30  ;;  %v4498_v45 = vcombine.high %v308_v38, %v312_v39  ;;  %v4500_v47 = vcombine.high %v309_v40, %v313_v41  ;;  %v356_v29 = vld [vmem:[#allocation7 + $0x2d0] sm:$0xff] }
 0x178   :  { %v4497_v52 = vcombine.low %v308_v38, %v312_v39  ;;  %v360_v30 = vld [vmem:[#allocation7 + $0x2f0] sm:$0xff] }
 0x179   :  { %v364_v38 = vld [vmem:[#allocation7 + $0x310] sm:$0xff] }
 0x17a   :  { %1914 = vmatpush1.bf16.msra.mxu0 %v4693_v50  ;;  %1996 = vmatpush1.bf16.msra.mxu1 %v4695_v51  ;;  %v317_v50 = vld [vmem:[#allocation7 + $0x198] sm:$0xff]  ;;  %v368_v39 = vld [vmem:[#allocation7 + $0x330] sm:$0xff] }
 0x17b   :  { %1915 = vmatprep.subr.bf16.mxu0 %v4702_v53  ;;  %1997 = vmatprep.subr.bf16.mxu1 %v4704_v55  ;;  %v321_v51 = vld [vmem:[#allocation7 + $0x1b8] sm:$0xff]  ;;  %v4499_v53 = vcombine.low %v309_v40, %v313_v41  ;;  %v4506_v55 = vcombine.high %v316_v48, %v320_v49 }
 0x17c   :  { %v4508_v56 = vcombine.high %v317_v50, %v321_v51  ;;  %v4507_v61 = vcombine.low %v317_v50, %v321_v51  ;;  %v365_v40 = vld [vmem:[#allocation7 + $0x318] sm:$0xff] }
 0x17d   :  { %v369_v41 = vld [vmem:[#allocation7 + $0x338] sm:$0xff] }
 0x17e   :  { %1916 = vmatpush1.bf16.msra.mxu0 %v4701_v59  ;;  %1998 = vmatpush1.bf16.msra.mxu1 %v4703_v60  ;;  %v329_v59 = vld [vmem:[#allocation7 + $0x1f8] sm:$0xff]  ;;  %v4505_v60 = vcombine.low %v316_v48, %v320_v49  ;;  %v372_v48 = vld [vmem:[#allocation7 + $0x350] sm:$0xff] }
 0x17f   :  { %2008 = vmatprep.subr.bf16.mxu0 %v4458_v62  ;;  %2090 = vmatprep.subr.bf16.mxu1 %v4460_v63  ;;  %v4514_v62 = vcombine.high %v324_v22, %v328_v57  ;;  %v4516_v63 = vcombine.high %v325_v58, %v329_v59  ;;  %v376_v49 = vld [vmem:[#allocation7 + $0x370] sm:$0xff]  ;;  %v373_v50 = vld [vmem:[#allocation7 + $0x358] sm:$0xff] }
 0x180   :  { %v377_v51 = vld [vmem:[#allocation7 + $0x378] sm:$0xff] }
 0x181   :  { %1918 = vmatmul.mubr.bf16.vlgmr.msra.gmra.mrb[4].mxu0 %v5842_v4  ;;  %2000 = vmatmul.mubr.bf16.vlgmr.msra.gmra.mrb[4].mxu1 %v5842_v4 }
 0x182   :  { %2009 = vmatpush1.bf16.msra.mxu0 %v4457_v3  ;;  %2040 = vmatprep.mubr.bf16.mxu0 %v5824_v44  ;;  %v4513_v3 = vcombine.low %v324_v22, %v328_v57  ;;  %v380_v22 = vld [vmem:[#allocation7 + $0x390] sm:$0xff] }
 0x183   :  { %2091 = vmatpush1.bf16.msra.mxu1 %v4459_v5  ;;  %2122 = vmatprep.mubr.bf16.mxu1 %v5824_v44  ;;  %v301_v44 = vld [vmem:[#allocation7 + $0x118] sm:$0xff]  ;;  %v4515_v5 = vcombine.low %v325_v58, %v329_v59  ;;  %v384_v57 = vld [vmem:[#allocation7 + $0x3b0] sm:$0xff] }
 0x184   :  { %2010 = vmatprep.subr.bf16.mxu0 %v4466_v6  ;;  %2092 = vmatprep.subr.bf16.mxu1 %v4468_v7  ;;  %v4492_v37 = vcombine.high %v301_v44, %v305_v32  ;;  %v4491_v43 = vcombine.low %v301_v44, %v305_v32  ;;  %v4522_v6 = vcombine.high %v332_v0, %v336_v1  ;;  %v357_v44 = vld [vmem:[#allocation7 + $0x2d8] sm:$0xff] }
 0x185   :  { %v4524_v7 = vcombine.high %v333_v36, %v337_v2  ;;  %v361_v32 = vld [vmem:[#allocation7 + $0x2f8] sm:$0xff] }
 0x186   :  { %2011 = vmatpush1.bf16.msra.mxu0 %v4465_v12  ;;  %v4521_v12 = vcombine.low %v332_v0, %v336_v1  ;;  %v381_v58 = vld [vmem:[#allocation7 + $0x398] sm:$0xff]  ;;  %v388_v0 = vld [vmem:[#allocation7 + $0x3d0] sm:$0xff] }
 0x187   :  { %2093 = vmatpush1.bf16.msra.mxu1 %v4467_v13  ;;  %2012 = vmatprep.subr.bf16.mxu0 %v4474_v14  ;;  %v4523_v13 = vcombine.low %v333_v36, %v337_v2  ;;  %v4530_v14 = vcombine.high %v340_v8, %v344_v9  ;;  %v385_v59 = vld [vmem:[#allocation7 + $0x3b8] sm:$0xff]  ;;  %v392_v1 = vld [vmem:[#allocation7 + $0x3f0] sm:$0xff] }
 0x188   :  { %2094 = vmatprep.subr.bf16.mxu1 %v4476_v15  ;;  %v4532_v15 = vcombine.high %v341_v10, %v345_v11  ;;  %v389_v36 = vld [vmem:[#allocation7 + $0x3d8] sm:$0xff] }
 0x189   :  { %v393_v2 = vld [vmem:[#allocation7 + $0x3f8] sm:$0xff] }
 0x18a   :  { %2013 = vmatpush1.bf16.msra.mxu0 %v4473_v24  ;;  %v4529_v24 = vcombine.low %v340_v8, %v344_v9  ;;  %v396_v8 = vld [vmem:[#allocation7 + $0x410] sm:$0xff] }
 0x18b   :  { %2095 = vmatpush1.bf16.msra.mxu1 %v4475_v26  ;;  %2014 = vmatprep.subr.bf16.mxu0 %v4482_v27  ;;  %v4531_v26 = vcombine.low %v341_v10, %v345_v11  ;;  %v4538_v27 = vcombine.high %v348_v16, %v352_v17  ;;  %v400_v9 = vld [vmem:[#allocation7 + $0x430] sm:$0xff]  ;;  %v397_v10 = vld [vmem:[#allocation7 + $0x418] sm:$0xff] }
 0x18c   :  { %2096 = vmatprep.subr.bf16.mxu1 %v4484_v28  ;;  %v4540_v28 = vcombine.high %v349_v18, %v353_v19  ;;  %v401_v11 = vld [vmem:[#allocation7 + $0x438] sm:$0xff] }
 0x18e   :  { %2015 = vmatpush1.bf16.msra.mxu0 %v4481_v33  ;;  %v4537_v33 = vcombine.low %v348_v16, %v352_v17  ;;  %v404_v16 = vld [vmem:[#allocation7 + $0x450] sm:$0xff] }
 0x18f   :  { %2097 = vmatpush1.bf16.msra.mxu1 %v4483_v34  ;;  %2016 = vmatprep.subr.bf16.mxu0 %v4490_v35  ;;  %v4539_v34 = vcombine.low %v349_v18, %v353_v19  ;;  %v4546_v35 = vcombine.high %v356_v29, %v360_v30  ;;  %v408_v17 = vld [vmem:[#allocation7 + $0x470] sm:$0xff]  ;;  %v4585_v18 = vcombine.low %v396_v8, %v400_v9  ;;  %v405_v19 = vld [vmem:[#allocation7 + $0x458] sm:$0xff] }
 0x190   :  { %2098 = vmatprep.subr.bf16.mxu1 %v4492_v37  ;;  %v4548_v37 = vcombine.high %v357_v44, %v361_v32 }
 0x192   :  { %2017 = vmatpush1.bf16.msra.mxu0 %v4489_v42  ;;  %v4545_v42 = vcombine.low %v356_v29, %v360_v30  ;;  %v416_v29 = vld [vmem:[#allocation7 + $0x4b0] sm:$0xff] }
 0x193   :  { %2099 = vmatpush1.bf16.msra.mxu1 %v4491_v43  ;;  %2018 = vmatprep.subr.bf16.mxu0 %v4498_v45  ;;  %v4547_v43 = vcombine.low %v357_v44, %v361_v32  ;;  %v4554_v45 = vcombine.high %v364_v38, %v368_v39  ;;  %v413_v44 = vld [vmem:[#allocation7 + $0x498] sm:$0xff] }
 0x194   :  { %2100 = vmatprep.subr.bf16.mxu1 %v4500_v47  ;;  %v4556_v47 = vcombine.high %v365_v40, %v369_v41  ;;  %v417_v32 = vld [vmem:[#allocation7 + $0x4b8] sm:$0xff] }
 0x196   :  { %2019 = vmatpush1.bf16.msra.mxu0 %v4497_v52  ;;  %v4553_v52 = vcombine.low %v364_v38, %v368_v39  ;;  %v420_v38 = vld [vmem:[#allocation7 + $0x4d0] sm:$0xff] }
 0x197   :  { %2101 = vmatpush1.bf16.msra.mxu1 %v4499_v53  ;;  %2020 = vmatprep.subr.bf16.mxu0 %v4506_v55  ;;  %v4555_v53 = vcombine.low %v365_v40, %v369_v41  ;;  %v4562_v55 = vcombine.high %v372_v48, %v376_v49  ;;  %v424_v39 = vld [vmem:[#allocation7 + $0x4f0] sm:$0xff]  ;;  %v421_v40 = vld [vmem:[#allocation7 + $0x4d8] sm:$0xff] }
 0x198   :  { %2102 = vmatprep.subr.bf16.mxu1 %v4508_v56  ;;  %v4564_v56 = vcombine.high %v373_v50, %v377_v51  ;;  %v425_v41 = vld [vmem:[#allocation7 + $0x4f8] sm:$0xff] }
 0x19a   :  { %2021 = vmatpush1.bf16.msra.mxu0 %v4505_v60  ;;  %v4561_v60 = vcombine.low %v372_v48, %v376_v49  ;;  %v432_v48 = vld [vmem:[#allocation7 + $0x530] sm:$0xff]  ;;  %v429_v49 = vld [vmem:[#allocation7 + $0x518] sm:$0xff] }
 0x19b   :  { %2103 = vmatpush1.bf16.msra.mxu1 %v4507_v61  ;;  %2022 = vmatprep.subr.bf16.mxu0 %v4514_v62  ;;  %v4563_v61 = vcombine.low %v373_v50, %v377_v51  ;;  %v4570_v62 = vcombine.high %v380_v22, %v384_v57  ;;  %v433_v50 = vld [vmem:[#allocation7 + $0x538] sm:$0xff]  ;;  %v4611_v51 = vcombine.low %v421_v40, %v425_v41 }
 0x19c   :  { %2104 = vmatprep.subr.bf16.mxu1 %v4516_v63  ;;  %v4572_v63 = vcombine.high %v381_v58, %v385_v59 }
 0x19e   :  { %2023 = vmatpush1.bf16.msra.mxu0 %v4513_v3  ;;  %v4569_v3 = vcombine.low %v380_v22, %v384_v57  ;;  %v437_v22 = vld [vmem:[#allocation7 + $0x558] sm:$0xff] }
 0x19f   :  { %2105 = vmatpush1.bf16.msra.mxu1 %v4515_v5  ;;  %2024 = vmatprep.subr.bf16.mxu0 %v4522_v6  ;;  %v4571_v5 = vcombine.low %v381_v58, %v385_v59  ;;  %v4578_v6 = vcombine.high %v388_v0, %v392_v1  ;;  %v441_v57 = vld [vmem:[#allocation7 + $0x578] sm:$0xff]  ;;  %v4619_v59 = vcombine.low %v429_v49, %v433_v50 }
 0x1a0   :  { %2106 = vmatprep.subr.bf16.mxu1 %v4524_v7  ;;  %v4580_v7 = vcombine.high %v389_v36, %v393_v2 }
 0x1a2   :  { %2025 = vmatpush1.bf16.msra.mxu0 %v4521_v12  ;;  %v4577_v12 = vcombine.low %v388_v0, %v392_v1  ;;  %v445_v0 = vld [vmem:[#allocation7 + $0x598] sm:$0xff] }
 0x1a3   :  { %2107 = vmatpush1.bf16.msra.mxu1 %v4523_v13  ;;  %2026 = vmatprep.subr.bf16.mxu0 %v4530_v14  ;;  %v4579_v13 = vcombine.low %v389_v36, %v393_v2  ;;  %v4586_v14 = vcombine.high %v396_v8, %v400_v9  ;;  %v449_v1 = vld [vmem:[#allocation7 + $0x5b8] sm:$0xff]  ;;  %v4627_v2 = vcombine.low %v437_v22, %v441_v57 }
 0x1a4   :  { %2108 = vmatprep.subr.bf16.mxu1 %v4532_v15  ;;  %v4588_v15 = vcombine.high %v397_v10, %v401_v11  ;;  %v453_v8 = vld [vmem:[#allocation7 + $0x5d8] sm:$0xff] }
 0x1a5   :  { %v457_v9 = vld [vmem:[#allocation7 + $0x5f8] sm:$0xff] }
 0x1a6   :  { %2027 = vmatpush1.bf16.msra.mxu0 %v4529_v24  ;;  %v409_v24 = vld [vmem:[#allocation7 + $0x478] sm:$0xff] }
 0x1a7   :  { %2109 = vmatpush1.bf16.msra.mxu1 %v4531_v26  ;;  %2028 = vmatprep.subr.bf16.mxu0 %v4538_v27  ;;  %v4587_v26 = vcombine.low %v397_v10, %v401_v11  ;;  %v4594_v27 = vcombine.high %v404_v16, %v408_v17  ;;  %v4596_v30 = vcombine.high %v405_v19, %v409_v24 }
 0x1a8   :  { %2110 = vmatprep.subr.bf16.mxu1 %v4540_v28  ;;  %v412_v28 = vld [vmem:[#allocation7 + $0x490] sm:$0xff]  ;;  %v4635_v11 = vcombine.low %v445_v0, %v449_v1 }
 0x1aa   :  { %2029 = vmatpush1.bf16.msra.mxu0 %v4537_v33  ;;  %v4593_v33 = vcombine.low %v404_v16, %v408_v17  ;;  %v461_v16 = vld [vmem:[#allocation7 + $0x618] sm:$0xff] }
 0x1ab   :  { %2111 = vmatpush1.bf16.msra.mxu1 %v4539_v34  ;;  %2030 = vmatprep.subr.bf16.mxu0 %v4546_v35  ;;  %v4595_v34 = vcombine.low %v405_v19, %v409_v24  ;;  %v4602_v35 = vcombine.high %v412_v28, %v416_v29  ;;  %v465_v17 = vld [vmem:[#allocation7 + $0x638] sm:$0xff]  ;;  %v4643_v19 = vcombine.low %v453_v8, %v457_v9 }
 0x1ac   :  { %2112 = vmatprep.subr.bf16.mxu1 %v4548_v37  ;;  %v4604_v37 = vcombine.high %v413_v44, %v417_v32 }
 0x1ae   :  { %2031 = vmatpush1.bf16.msra.mxu0 %v4545_v42  ;;  %v4601_v42 = vcombine.low %v412_v28, %v416_v29  ;;  %v472_v28 = vld [vmem:[#allocation7 + $0x670] sm:$0xff]  ;;  %v469_v29 = vld [vmem:[#allocation7 + $0x658] sm:$0xff] }
 0x1af   :  { %2113 = vmatpush1.bf16.msra.mxu1 %v4547_v43  ;;  %2032 = vmatprep.subr.bf16.mxu0 %v4554_v45  ;;  %v4610_v43 = vcombine.high %v420_v38, %v424_v39  ;;  %v4612_v45 = vcombine.high %v421_v40, %v425_v41 }
 0x1b0   :  { %2114 = vmatprep.subr.bf16.mxu1 %v4556_v47  ;;  %v428_v47 = vld [vmem:[#allocation7 + $0x510] sm:$0xff] }
 0x1b1   :  { %v4617_v58 = vcombine.low %v428_v47, %v432_v48 }
 0x1b2   :  { %2033 = vmatpush1.bf16.msra.mxu0 %v4553_v52  ;;  %v4618_v52 = vcombine.high %v428_v47, %v432_v48  ;;  %v485_v47 = vld [vmem:[#allocation7 + $0x6d8] sm:$0xff] }
 0x1b3   :  { %2115 = vmatpush1.bf16.msra.mxu1 %v4555_v53  ;;  %2034 = vmatprep.subr.bf16.mxu0 %v4562_v55  ;;  %v4620_v53 = vcombine.high %v429_v49, %v433_v50  ;;  %v436_v55 = vld [vmem:[#allocation7 + $0x550] sm:$0xff]  ;;  %v489_v48 = vld [vmem:[#allocation7 + $0x6f8] sm:$0xff] }
 0x1b4   :  { %2116 = vmatprep.subr.bf16.mxu1 %v4564_v56  ;;  %v440_v56 = vld [vmem:[#allocation7 + $0x570] sm:$0xff] }
 0x1b5   :  { %v4625_v36 = vcombine.low %v436_v55, %v440_v56 }
 0x1b6   :  { %2035 = vmatpush1.bf16.msra.mxu0 %v4561_v60  ;;  %v4626_v60 = vcombine.high %v436_v55, %v440_v56  ;;  %v493_v55 = vld [vmem:[#allocation7 + $0x718] sm:$0xff] }
 0x1b7   :  { %2117 = vmatpush1.bf16.msra.mxu1 %v4563_v61  ;;  %2036 = vmatprep.subr.bf16.mxu0 %v4570_v62  ;;  %v4628_v61 = vcombine.high %v437_v22, %v441_v57  ;;  %v444_v62 = vld [vmem:[#allocation7 + $0x590] sm:$0xff]  ;;  %v497_v56 = vld [vmem:[#allocation7 + $0x738] sm:$0xff]  ;;  %v4675_v57 = vcombine.low %v485_v47, %v489_v48 }
 0x1b8   :  { %2118 = vmatprep.subr.bf16.mxu1 %v4572_v63  ;;  %v448_v63 = vld [vmem:[#allocation7 + $0x5b0] sm:$0xff] }
 0x1b9   :  { %v4633_v10 = vcombine.low %v444_v62, %v448_v63 }
 0x1ba   :  { %2037 = vmatpush1.bf16.msra.mxu0 %v4569_v3  ;;  %v4634_v3 = vcombine.high %v444_v62, %v448_v63  ;;  %v501_v62 = vld [vmem:[#allocation7 + $0x758] sm:$0xff] }
 0x1bb   :  { %2119 = vmatpush1.bf16.msra.mxu1 %v4571_v5  ;;  %2038 = vmatprep.subr.bf16.mxu0 %v4578_v6  ;;  %v4636_v5 = vcombine.high %v445_v0, %v449_v1  ;;  %v452_v6 = vld [vmem:[#allocation7 + $0x5d0] sm:$0xff]  ;;  %v505_v63 = vld [vmem:[#allocation7 + $0x778] sm:$0xff]  ;;  %v4683_v1 = vcombine.low %v493_v55, %v497_v56 }
 0x1bc   :  { %2120 = vmatprep.subr.bf16.mxu1 %v4580_v7  ;;  %v456_v7 = vld [vmem:[#allocation7 + $0x5f0] sm:$0xff] }
 0x1be   :  { %2039 = vmatpush1.bf16.msra.mxu0 %v4577_v12  ;;  %v4642_v12 = vcombine.high %v452_v6, %v456_v7 }
 0x1bf   :  { %2121 = vmatpush1.bf16.msra.mxu1 %v4579_v13  ;;  %2049 = vmatprep.subr.bf16.mxu0 %v4586_v14  ;;  %v4644_v13 = vcombine.high %v453_v8, %v457_v9  ;;  %v460_v14 = vld [vmem:[#allocation7 + $0x610] sm:$0xff]  ;;  %v4691_v9 = vcombine.low %v501_v62, %v505_v63 }
 0x1c0   :  { %2131 = vmatprep.subr.bf16.mxu1 %v4588_v15  ;;  %v464_v15 = vld [vmem:[#allocation7 + $0x630] sm:$0xff] }
 0x1c1   :  { %2041 = vmatmul.mubr.bf16.vlgmr.msra.gmra.mrb[8].mxu0 %v5826_v46  ;;  %v4650_v24 = vcombine.high %v460_v14, %v464_v15 }
 0x1c2   :  { %2123 = vmatmul.mubr.bf16.vlgmr.msra.gmra.mrb[8].mxu1 %v5826_v46  ;;  %2050 = vmatpush1.bf16.msra.mxu0 %v4585_v18  ;;  %v4603_v46 = vcombine.low %v413_v44, %v417_v32  ;;  %v4641_v18 = vcombine.low %v452_v6, %v456_v7  ;;  %v4649_v44 = vcombine.low %v460_v14, %v464_v15  ;;  %v509_v6 = vld [vmem:[#allocation7 + $0x798] sm:$0xff] }
 0x1c3   :  { %2081 = vmatprep.mubr.bf16.mxu0 %v5832_v54  ;;  %2132 = vmatpush1.bf16.msra.mxu1 %v4587_v26  ;;  %v4652_v26 = vcombine.high %v461_v16, %v465_v17  ;;  %v4651_v32 = vcombine.low %v461_v16, %v465_v17  ;;  %v513_v7 = vld [vmem:[#allocation7 + $0x7b8] sm:$0xff] }
 0x1c4   :  { %2163 = vmatprep.mubr.bf16.mxu1 %v5832_v54  ;;  %2051 = vmatprep.subr.bf16.mxu0 %v4594_v27  ;;  %v4609_v54 = vcombine.low %v420_v38, %v424_v39  ;;  %v468_v27 = vld [vmem:[#allocation7 + $0x650] sm:$0xff]  ;;  %v477_v38 = vld [vmem:[#allocation7 + $0x698] sm:$0xff]  ;;  %v4699_v17 = vcombine.low %v509_v6, %v513_v7 }
 0x1c5   :  { %2133 = vmatprep.subr.bf16.mxu1 %v4596_v30  ;;  %v473_v30 = vld [vmem:[#allocation7 + $0x678] sm:$0xff]  ;;  %v4657_v40 = vcombine.low %v468_v27, %v472_v28 }
 0x1c6   :  { %2052 = vmatpush1.bf16.msra.mxu0 %v4593_v33  ;;  %v4658_v33 = vcombine.high %v468_v27, %v472_v28  ;;  %v481_v39 = vld [vmem:[#allocation7 + $0x6b8] sm:$0xff]  ;;  %v4659_v41 = vcombine.low %v469_v29, %v473_v30  ;;  %v5121_v27 = vld [vmem:[#allocation8 + $0x4] ss:$16 sps:$4 sm:$0xff]  }
 0x1c7   :  { %2134 = vmatpush1.bf16.msra.mxu1 %v4595_v34  ;;  %2053 = vmatprep.subr.bf16.mxu0 %v4602_v35  ;;  %v4660_v34 = vcombine.high %v469_v29, %v473_v30  ;;  %v476_v35 = vld [vmem:[#allocation7 + $0x690] sm:$0xff]  ;;  %v4667_v50 = vcombine.low %v477_v38, %v481_v39  ;;  %v517_v14 = vld [vmem:[#allocation7 + $0x7d8] sm:$0xff] }
 0x1c8   :  { %2135 = vmatprep.subr.bf16.mxu1 %v4604_v37  ;;  %v480_v37 = vld [vmem:[#allocation7 + $0x6b0] sm:$0xff]  ;;  %v521_v15 = vld [vmem:[#allocation7 + $0x7f8] sm:$0xff] }
 0x1c9   :  { %v4665_v49 = vcombine.low %v476_v35, %v480_v37  ;;  %v5124_v28 = vld [vmem:[#allocation8 + $0xc] ss:$16 sps:$4 sm:$0xff]   ;;  %v5119_v29 = vld [vmem:[#allocation8] ss:$16 sps:$4 sm:$0xff]   ;;  %v5122_v30 = vld [vmem:[#allocation8 + $0x8] ss:$16 sps:$4 sm:$0xff]  }
 0x1ca   :  { %2054 = vmatpush1.bf16.msra.mxu0 %v4601_v42  ;;  %v4666_v42 = vcombine.high %v476_v35, %v480_v37  ;;  %v5133_v35 = vld [vmem:[#allocation8 + $0x44] ss:$16 sps:$4 sm:$0xff]   ;;  %v5136_v37 = vld [vmem:[#allocation8 + $0x4c] ss:$16 sps:$4 sm:$0xff]  }
 0x1cb   :  { %2136 = vmatpush1.bf16.msra.mxu1 %v4603_v46  ;;  %2055 = vmatprep.subr.bf16.mxu0 %v4610_v43  ;;  %v4668_v46 = vcombine.high %v477_v38, %v481_v39  ;;  %v484_v43 = vld [vmem:[#allocation7 + $0x6d0] sm:$0xff]  ;;  %v5134_v39 = vld [vmem:[#allocation8 + $0x48] ss:$16 sps:$4 sm:$0xff]  }
 0x1cc   :  { %2137 = vmatprep.subr.bf16.mxu1 %v4612_v45  ;;  %v488_v45 = vld [vmem:[#allocation7 + $0x6f0] sm:$0xff] }
 0x1cd   :  { %v4673_v22 = vcombine.low %v484_v43, %v488_v45  ;;  %v5131_v38 = vld [vmem:[#allocation8 + $0x40] ss:$16 sps:$4 sm:$0xff]  }
 0x1ce   :  { %2056 = vmatpush1.bf16.msra.mxu0 %v4609_v54  ;;  %v4674_v54 = vcombine.high %v484_v43, %v488_v45  ;;  %v5148_v43 = vld [vmem:[#allocation8 + $0x8c] ss:$16 sps:$4 sm:$0xff]   ;;  %v5143_v45 = vld [vmem:[#allocation8 + $0x80] ss:$16 sps:$4 sm:$0xff]  }
 0x1cf   :  { %2138 = vmatpush1.bf16.msra.mxu1 %v4611_v51  ;;  %2057 = vmatprep.subr.bf16.mxu0 %v4618_v52  ;;  %v4676_v51 = vcombine.high %v485_v47, %v489_v48  ;;  %v492_v52 = vld [vmem:[#allocation7 + $0x710] sm:$0xff]  ;;  %v5146_v47 = vld [vmem:[#allocation8 + $0x88] ss:$16 sps:$4 sm:$0xff]  }
 0x1d0   :  { %2139 = vmatprep.subr.bf16.mxu1 %v4620_v53  ;;  %v496_v53 = vld [vmem:[#allocation7 + $0x730] sm:$0xff] }
 0x1d1   :  { %v4681_v0 = vcombine.low %v492_v52, %v496_v53  ;;  %v5151_v48 = vld [vmem:[#allocation8 + $0xa4] ss:$16 sps:$4 sm:$0xff]  }
 0x1d2   :  { %2058 = vmatpush1.bf16.msra.mxu0 %v4617_v58  ;;  %v4682_v58 = vcombine.high %v492_v52, %v496_v53  ;;  %v5160_v52 = vld [vmem:[#allocation8 + $0xcc] ss:$16 sps:$4 sm:$0xff]   ;;  %v5155_v53 = vld [vmem:[#allocation8 + $0xc0] ss:$16 sps:$4 sm:$0xff]  }
 0x1d3   :  { %2140 = vmatpush1.bf16.msra.mxu1 %v4619_v59  ;;  %2059 = vmatprep.subr.bf16.mxu0 %v4626_v60  ;;  %v4684_v59 = vcombine.high %v493_v55, %v497_v56  ;;  %v500_v60 = vld [vmem:[#allocation7 + $0x750] sm:$0xff]  ;;  %v5158_v55 = vld [vmem:[#allocation8 + $0xc8] ss:$16 sps:$4 sm:$0xff]  }
 0x1d4   :  { %2141 = vmatprep.subr.bf16.mxu1 %v4628_v61  ;;  %v504_v61 = vld [vmem:[#allocation7 + $0x770] sm:$0xff] }
 0x1d5   :  { %v4689_v8 = vcombine.low %v500_v60, %v504_v61  ;;  %v5163_v56 = vld [vmem:[#allocation8 + $0xe4] ss:$16 sps:$4 sm:$0xff]  }
 0x1d6   :  { %2060 = vmatpush1.bf16.msra.mxu0 %v4625_v36  ;;  %v4690_v36 = vcombine.high %v500_v60, %v504_v61  ;;  %v5172_v60 = vld [vmem:[#allocation8 + $0x10c] ss:$16 sps:$4 sm:$0xff]   ;;  %v5167_v61 = vld [vmem:[#allocation8 + $0x100] ss:$16 sps:$4 sm:$0xff]  }
 0x1d7   :  { %2142 = vmatpush1.bf16.msra.mxu1 %v4627_v2  ;;  %2061 = vmatprep.subr.bf16.mxu0 %v4634_v3  ;;  %v4692_v2 = vcombine.high %v501_v62, %v505_v63  ;;  %v508_v3 = vld [vmem:[#allocation7 + $0x790] sm:$0xff]  ;;  %v5170_v62 = vld [vmem:[#allocation8 + $0x108] ss:$16 sps:$4 sm:$0xff]  }
 0x1d8   :  { %2143 = vmatprep.subr.bf16.mxu1 %v4636_v5  ;;  %v512_v5 = vld [vmem:[#allocation7 + $0x7b0] sm:$0xff] }
 0x1d9   :  { %v4697_v16 = vcombine.low %v508_v3, %v512_v5  ;;  %v5175_v63 = vld [vmem:[#allocation8 + $0x124] ss:$16 sps:$4 sm:$0xff]  }
 0x1da   :  { %2062 = vmatpush1.bf16.msra.mxu0 %v4633_v10  ;;  %v4698_v10 = vcombine.high %v508_v3, %v512_v5  ;;  %v5184_v3 = vld [vmem:[#allocation8 + $0x14c] ss:$16 sps:$4 sm:$0xff]   ;;  %v5179_v5 = vld [vmem:[#allocation8 + $0x140] ss:$16 sps:$4 sm:$0xff]  }
 0x1db   :  { %2144 = vmatpush1.bf16.msra.mxu1 %v4635_v11  ;;  %2063 = vmatprep.subr.bf16.mxu0 %v4642_v12  ;;  %v4700_v11 = vcombine.high %v509_v6, %v513_v7  ;;  %v516_v12 = vld [vmem:[#allocation7 + $0x7d0] sm:$0xff]  ;;  %v5182_v6 = vld [vmem:[#allocation8 + $0x148] ss:$16 sps:$4 sm:$0xff]  }
 0x1dc   :  { %2145 = vmatprep.subr.bf16.mxu1 %v4644_v13  ;;  %v520_v13 = vld [vmem:[#allocation7 + $0x7f0] sm:$0xff] }
 0x1dd   :  { %v5187_v7 = vld [vmem:[#allocation8 + $0x164] ss:$16 sps:$4 sm:$0xff]  }
 0x1de   :  { %2064 = vmatpush1.bf16.msra.mxu0 %v4641_v18  ;;  %v4706_v18 = vcombine.high %v516_v12, %v520_v13 }
 0x1df   :  { %2146 = vmatpush1.bf16.msra.mxu1 %v4643_v19  ;;  %2065 = vmatprep.subr.bf16.mxu0 %v4650_v24  ;;  %v4708_v19 = vcombine.high %v517_v14, %v521_v15  ;;  %v4705_v24 = vcombine.low %v516_v12, %v520_v13  ;;  %v5196_v12 = vld [vmem:[#allocation8 + $0x18c] ss:$16 sps:$4 sm:$0xff]   ;;  %v5191_v13 = vld [vmem:[#allocation8 + $0x180] ss:$16 sps:$4 sm:$0xff]  }
 0x1e0   :  { %2147 = vmatprep.subr.bf16.mxu1 %v4652_v26  ;;  %v4707_v26 = vcombine.low %v517_v14, %v521_v15  ;;  %v5194_v14 = vld [vmem:[#allocation8 + $0x188] ss:$16 sps:$4 sm:$0xff]   ;;  %v5199_v15 = vld [vmem:[#allocation8 + $0x1a4] ss:$16 sps:$4 sm:$0xff]  }
 0x1e2   :  { %2066 = vmatpush1.bf16.msra.mxu0 %v4649_v44  ;;  %v5127_v44 = vld [vmem:[#allocation8 + $0x24] ss:$16 sps:$4 sm:$0xff]  }
 0x1e3   :  { %2148 = vmatpush1.bf16.msra.mxu1 %v4651_v32  ;;  %2067 = vmatprep.subr.bf16.mxu0 %v4658_v33  ;;  %v5130_v32 = vld [vmem:[#allocation8 + $0x2c] ss:$16 sps:$4 sm:$0xff]   ;;  %v5125_v33 = vld [vmem:[#allocation8 + $0x20] ss:$16 sps:$4 sm:$0xff]  }
 0x1e4   :  { %2149 = vmatprep.subr.bf16.mxu1 %v4660_v34  ;;  %v5128_v34 = vld [vmem:[#allocation8 + $0x28] ss:$16 sps:$4 sm:$0xff]  }
 0x1e6   :  { %2068 = vmatpush1.bf16.msra.mxu0 %v4657_v40  ;;  %v5139_v40 = vld [vmem:[#allocation8 + $0x64] ss:$16 sps:$4 sm:$0xff]  }
 0x1e7   :  { %2150 = vmatpush1.bf16.msra.mxu1 %v4659_v41  ;;  %2069 = vmatprep.subr.bf16.mxu0 %v4666_v42  ;;  %v5142_v41 = vld [vmem:[#allocation8 + $0x6c] ss:$16 sps:$4 sm:$0xff]   ;;  %v5137_v42 = vld [vmem:[#allocation8 + $0x60] ss:$16 sps:$4 sm:$0xff]  }
 0x1e8   :  { %2151 = vmatprep.subr.bf16.mxu1 %v4668_v46  ;;  %v5145_v46 = vld [vmem:[#allocation8 + $0x84] ss:$16 sps:$4 sm:$0xff]  }
 0x1ea   :  { %2070 = vmatpush1.bf16.msra.mxu0 %v4665_v49  ;;  %v5154_v49 = vld [vmem:[#allocation8 + $0xac] ss:$16 sps:$4 sm:$0xff]  }
 0x1eb   :  { %2152 = vmatpush1.bf16.msra.mxu1 %v4667_v50  ;;  %2071 = vmatprep.subr.bf16.mxu0 %v4674_v54  ;;  %v5149_v50 = vld [vmem:[#allocation8 + $0xa0] ss:$16 sps:$4 sm:$0xff]   ;;  %v5152_v54 = vld [vmem:[#allocation8 + $0xa8] ss:$16 sps:$4 sm:$0xff]  }
 0x1ec   :  { %2153 = vmatprep.subr.bf16.mxu1 %v4676_v51  ;;  %v5157_v51 = vld [vmem:[#allocation8 + $0xc4] ss:$16 sps:$4 sm:$0xff]  }
 0x1ee   :  { %2072 = vmatpush1.bf16.msra.mxu0 %v4673_v22  ;;  %v5166_v22 = vld [vmem:[#allocation8 + $0xec] ss:$16 sps:$4 sm:$0xff]  }
 0x1ef   :  { %2154 = vmatpush1.bf16.msra.mxu1 %v4675_v57  ;;  %2073 = vmatprep.subr.bf16.mxu0 %v4682_v58  ;;  %v5161_v57 = vld [vmem:[#allocation8 + $0xe0] ss:$16 sps:$4 sm:$0xff]   ;;  %v5164_v58 = vld [vmem:[#allocation8 + $0xe8] ss:$16 sps:$4 sm:$0xff]  }
 0x1f0   :  { %2155 = vmatprep.subr.bf16.mxu1 %v4684_v59  ;;  %v5169_v59 = vld [vmem:[#allocation8 + $0x104] ss:$16 sps:$4 sm:$0xff]  }
 0x1f2   :  { %2074 = vmatpush1.bf16.msra.mxu0 %v4681_v0  ;;  %v5178_v0 = vld [vmem:[#allocation8 + $0x12c] ss:$16 sps:$4 sm:$0xff]  }
 0x1f3   :  { %2156 = vmatpush1.bf16.msra.mxu1 %v4683_v1  ;;  %2075 = vmatprep.subr.bf16.mxu0 %v4690_v36  ;;  %v5173_v1 = vld [vmem:[#allocation8 + $0x120] ss:$16 sps:$4 sm:$0xff]   ;;  %v5176_v36 = vld [vmem:[#allocation8 + $0x128] ss:$16 sps:$4 sm:$0xff]  }
 0x1f4   :  { %2157 = vmatprep.subr.bf16.mxu1 %v4692_v2  ;;  %v5181_v2 = vld [vmem:[#allocation8 + $0x144] ss:$16 sps:$4 sm:$0xff]  }
 0x1f6   :  { %2076 = vmatpush1.bf16.msra.mxu0 %v4689_v8  ;;  %v5190_v8 = vld [vmem:[#allocation8 + $0x16c] ss:$16 sps:$4 sm:$0xff]  }
 0x1f7   :  { %2158 = vmatpush1.bf16.msra.mxu1 %v4691_v9  ;;  %2077 = vmatprep.subr.bf16.mxu0 %v4698_v10  ;;  %v5185_v9 = vld [vmem:[#allocation8 + $0x160] ss:$16 sps:$4 sm:$0xff]   ;;  %v5188_v10 = vld [vmem:[#allocation8 + $0x168] ss:$16 sps:$4 sm:$0xff]  }
 0x1f8   :  { %2159 = vmatprep.subr.bf16.mxu1 %v4700_v11  ;;  %v5193_v11 = vld [vmem:[#allocation8 + $0x184] ss:$16 sps:$4 sm:$0xff]  }
 0x1fa   :  { %2078 = vmatpush1.bf16.msra.mxu0 %v4697_v16  ;;  %v5202_v16 = vld [vmem:[#allocation8 + $0x1ac] ss:$16 sps:$4 sm:$0xff]  }
 0x1fb   :  { %2160 = vmatpush1.bf16.msra.mxu1 %v4699_v17  ;;  %2079 = vmatprep.subr.bf16.mxu0 %v4706_v18  ;;  %v5197_v17 = vld [vmem:[#allocation8 + $0x1a0] ss:$16 sps:$4 sm:$0xff]   ;;  %v5200_v18 = vld [vmem:[#allocation8 + $0x1a8] ss:$16 sps:$4 sm:$0xff]  }
 0x1fc   :  { %2161 = vmatprep.subr.bf16.mxu1 %v4708_v19  ;;  %v5205_v19 = vld [vmem:[#allocation8 + $0x1c4] ss:$16 sps:$4 sm:$0xff]  }
 0x1fe   :  { %2080 = vmatpush1.bf16.msra.mxu0 %v4705_v24  ;;  %v5208_v24 = vld [vmem:[#allocation8 + $0x1cc] ss:$16 sps:$4 sm:$0xff]  }
 0x1ff   :  { %2162 = vmatpush1.bf16.msra.mxu1 %v4707_v26  ;;  %3746 = vmatprep.subr.bf16.mxu0 %v5121_v27  ;;  %v5203_v26 = vld [vmem:[#allocation8 + $0x1c0] ss:$16 sps:$4 sm:$0xff]   ;;  %v5206_v27 = vld [vmem:[#allocation8 + $0x1c8] ss:$16 sps:$4 sm:$0xff]  }
 0x200   :  { %3910 = vmatprep.subr.bf16.mxu1 %v5124_v28  ;;  %v5211_v28 = vld [vmem:[#allocation8 + $0x1e4] ss:$16 sps:$4 sm:$0xff]  }
 0x201   :  { %2082 = vmatmul.mubr.bf16.vlgmr.msra.gmra.mrb[8].mxu0 %v5842_v4 }
 0x202   :  { %2164 = vmatmul.mubr.bf16.vlgmr.msra.gmra.mrb[8].mxu1 %v5842_v4  ;;  %3747 = vmatpush1.bf16.msra.mxu0 %v5119_v29  ;;  %v5140_v4 = vld [vmem:[#allocation8 + $0x68] ss:$16 sps:$4 sm:$0xff]   ;;  %v5214_v29 = vld [vmem:[#allocation8 + $0x1ec] ss:$16 sps:$4 sm:$0xff]  }
 0x203   :  { %3911 = vmatpush1.bf16.msra.mxu1 %v5122_v30  ;;  %3748 = vmatprep.subr.bf16.mxu0 %v5127_v44  ;;  %v5209_v30 = vld [vmem:[#allocation8 + $0x1e0] ss:$16 sps:$4 sm:$0xff]   ;;  %v5212_v44 = vld [vmem:[#allocation8 + $0x1e8] ss:$16 sps:$4 sm:$0xff]  }
 0x204   :  { %3912 = vmatprep.subr.bf16.mxu1 %v5130_v32  ;;  %v5217_v32 = vld [vmem:[#allocation8 + $0x204] ss:$16 sps:$4 sm:$0xff]  }
 0x206   :  { %3749 = vmatpush1.bf16.msra.mxu0 %v5125_v33  ;;  %v5220_v33 = vld [vmem:[#allocation8 + $0x20c] ss:$16 sps:$4 sm:$0xff]  }
 0x207   :  { %3913 = vmatpush1.bf16.msra.mxu1 %v5128_v34  ;;  %3750 = vmatprep.subr.bf16.mxu0 %v5133_v35  ;;  %v5857_v34 = vld [vmem:[%s5907_s4] sm:$0xff] }
 0x208   :  { %3914 = vmatprep.subr.bf16.mxu1 %v5136_v37  ;;  %v527_v35 = vrot.slane %v5857_v34, %v5803_v21  ;;  %v531_v37 = vrot.slane %v5857_v34, %v5811_v23 }
 0x20a   :  { %3751 = vmatpush1.bf16.msra.mxu0 %v5131_v38  ;;  %v539_v38 = vrot.slane %v5857_v34, %v5816_v25 }
 0x20b   :  { %3915 = vmatpush1.bf16.msra.mxu1 %v5134_v39  ;;  %3752 = vmatprep.subr.bf16.mxu0 %v5139_v40 }
 0x20c   :  { %3916 = vmatprep.subr.bf16.mxu1 %v5142_v41 }
 0x20e   :  { %3753 = vmatpush1.bf16.msra.mxu0 %v5137_v42 }
 0x20f   :  { %3917 = vmatpush1.bf16.msra.mxu1 %v5140_v4  ;;  %3754 = vmatprep.subr.bf16.mxu0 %v5145_v46 }
 0x210   :  { %3918 = vmatprep.subr.bf16.mxu1 %v5148_v43 }
 0x212   :  { %3755 = vmatpush1.bf16.msra.mxu0 %v5143_v45 }
 0x213   :  { %3919 = vmatpush1.bf16.msra.mxu1 %v5146_v47  ;;  %3756 = vmatprep.subr.bf16.mxu0 %v5151_v48 }
 0x214   :  { %3920 = vmatprep.subr.bf16.mxu1 %v5154_v49 }
 0x216   :  { %3757 = vmatpush1.bf16.msra.mxu0 %v5149_v50 }
 0x217   :  { %3921 = vmatpush1.bf16.msra.mxu1 %v5152_v54  ;;  %3758 = vmatprep.subr.bf16.mxu0 %v5157_v51 }
 0x218   :  { %3922 = vmatprep.subr.bf16.mxu1 %v5160_v52 }
 0x21a   :  { %3759 = vmatpush1.bf16.msra.mxu0 %v5155_v53  ;;  %v5215_v53 = vld [vmem:[#allocation8 + $0x200] ss:$16 sps:$4 sm:$0xff]  }
 0x21b   :  { %3923 = vmatpush1.bf16.msra.mxu1 %v5158_v55  ;;  %3760 = vmatprep.subr.bf16.mxu0 %v5163_v56  ;;  %v5218_v55 = vld [vmem:[#allocation8 + $0x208] ss:$16 sps:$4 sm:$0xff]  }
 0x21c   :  { %3924 = vmatprep.subr.bf16.mxu1 %v5166_v22  ;;  %v5223_v22 = vld [vmem:[#allocation8 + $0x224] ss:$16 sps:$4 sm:$0xff]  }
 0x21e   :  { %3761 = vmatpush1.bf16.msra.mxu0 %v5161_v57  ;;  %v5226_v57 = vld [vmem:[#allocation8 + $0x22c] ss:$16 sps:$4 sm:$0xff]  }
 0x21f   :  { %3925 = vmatpush1.bf16.msra.mxu1 %v5164_v58  ;;  %3762 = vmatprep.subr.bf16.mxu0 %v5169_v59  ;;  %v5221_v59 = vld [vmem:[#allocation8 + $0x220] ss:$16 sps:$4 sm:$0xff]  }
 0x220   :  { %3926 = vmatprep.subr.bf16.mxu1 %v5172_v60  ;;  %v5224_v60 = vld [vmem:[#allocation8 + $0x228] ss:$16 sps:$4 sm:$0xff]  }
 0x222   :  { %3763 = vmatpush1.bf16.msra.mxu0 %v5167_v61  ;;  %v5229_v61 = vld [vmem:[#allocation8 + $0x244] ss:$16 sps:$4 sm:$0xff]  }
 0x223   :  { %3927 = vmatpush1.bf16.msra.mxu1 %v5170_v62  ;;  %3764 = vmatprep.subr.bf16.mxu0 %v5175_v63  ;;  %v5232_v62 = vld [vmem:[#allocation8 + $0x24c] ss:$16 sps:$4 sm:$0xff]   ;;  %v5227_v63 = vld [vmem:[#allocation8 + $0x240] ss:$16 sps:$4 sm:$0xff]  }
 0x224   :  { %3928 = vmatprep.subr.bf16.mxu1 %v5178_v0  ;;  %v5230_v0 = vld [vmem:[#allocation8 + $0x248] ss:$16 sps:$4 sm:$0xff]  }
 0x226   :  { %3765 = vmatpush1.bf16.msra.mxu0 %v5173_v1  ;;  %v5235_v1 = vld [vmem:[#allocation8 + $0x264] ss:$16 sps:$4 sm:$0xff]  }
 0x227   :  { %3929 = vmatpush1.bf16.msra.mxu1 %v5176_v36  ;;  %3766 = vmatprep.subr.bf16.mxu0 %v5181_v2  ;;  %v5238_v36 = vld [vmem:[#allocation8 + $0x26c] ss:$16 sps:$4 sm:$0xff]   ;;  %v5233_v2 = vld [vmem:[#allocation8 + $0x260] ss:$16 sps:$4 sm:$0xff]  }
 0x228   :  { %3930 = vmatprep.subr.bf16.mxu1 %v5184_v3  ;;  %v5236_v3 = vld [vmem:[#allocation8 + $0x268] ss:$16 sps:$4 sm:$0xff]  }
 0x22a   :  { %3767 = vmatpush1.bf16.msra.mxu0 %v5179_v5  ;;  %v5241_v5 = vld [vmem:[#allocation8 + $0x284] ss:$16 sps:$4 sm:$0xff]  }
 0x22b   :  { %3931 = vmatpush1.bf16.msra.mxu1 %v5182_v6  ;;  %3768 = vmatprep.subr.bf16.mxu0 %v5187_v7  ;;  %v5244_v6 = vld [vmem:[#allocation8 + $0x28c] ss:$16 sps:$4 sm:$0xff]   ;;  %v5239_v7 = vld [vmem:[#allocation8 + $0x280] ss:$16 sps:$4 sm:$0xff]  }
 0x22c   :  { %3932 = vmatprep.subr.bf16.mxu1 %v5190_v8  ;;  %v5242_v8 = vld [vmem:[#allocation8 + $0x288] ss:$16 sps:$4 sm:$0xff]  }
 0x22e   :  { %3769 = vmatpush1.bf16.msra.mxu0 %v5185_v9  ;;  %v5247_v9 = vld [vmem:[#allocation8 + $0x2a4] ss:$16 sps:$4 sm:$0xff]  }
 0x22f   :  { %3933 = vmatpush1.bf16.msra.mxu1 %v5188_v10  ;;  %3770 = vmatprep.subr.bf16.mxu0 %v5193_v11  ;;  %v5250_v10 = vld [vmem:[#allocation8 + $0x2ac] ss:$16 sps:$4 sm:$0xff]   ;;  %v5245_v11 = vld [vmem:[#allocation8 + $0x2a0] ss:$16 sps:$4 sm:$0xff]  }
 0x230   :  { %3934 = vmatprep.subr.bf16.mxu1 %v5196_v12  ;;  %v5248_v12 = vld [vmem:[#allocation8 + $0x2a8] ss:$16 sps:$4 sm:$0xff]  }
 0x232   :  { %3771 = vmatpush1.bf16.msra.mxu0 %v5191_v13  ;;  %v5253_v13 = vld [vmem:[#allocation8 + $0x2c4] ss:$16 sps:$4 sm:$0xff]  }
 0x233   :  { %3935 = vmatpush1.bf16.msra.mxu1 %v5194_v14  ;;  %3772 = vmatprep.subr.bf16.mxu0 %v5199_v15  ;;  %v5256_v14 = vld [vmem:[#allocation8 + $0x2cc] ss:$16 sps:$4 sm:$0xff]   ;;  %v5251_v15 = vld [vmem:[#allocation8 + $0x2c0] ss:$16 sps:$4 sm:$0xff]  }
 0x234   :  { %3936 = vmatprep.subr.bf16.mxu1 %v5202_v16  ;;  %v5254_v16 = vld [vmem:[#allocation8 + $0x2c8] ss:$16 sps:$4 sm:$0xff]  }
 0x236   :  { %3773 = vmatpush1.bf16.msra.mxu0 %v5197_v17  ;;  %v5259_v17 = vld [vmem:[#allocation8 + $0x2e4] ss:$16 sps:$4 sm:$0xff]  }
 0x237   :  { %3937 = vmatpush1.bf16.msra.mxu1 %v5200_v18  ;;  %3774 = vmatprep.subr.bf16.mxu0 %v5205_v19  ;;  %v5262_v18 = vld [vmem:[#allocation8 + $0x2ec] ss:$16 sps:$4 sm:$0xff]   ;;  %v5257_v19 = vld [vmem:[#allocation8 + $0x2e0] ss:$16 sps:$4 sm:$0xff]  }
 0x238   :  { %3938 = vmatprep.subr.bf16.mxu1 %v5208_v24  ;;  %v5260_v24 = vld [vmem:[#allocation8 + $0x2e8] ss:$16 sps:$4 sm:$0xff]  }
 0x23a   :  { %3775 = vmatpush1.bf16.msra.mxu0 %v5203_v26  ;;  %v5265_v26 = vld [vmem:[#allocation8 + $0x304] ss:$16 sps:$4 sm:$0xff]  }
 0x23b   :  { %3939 = vmatpush1.bf16.msra.mxu1 %v5206_v27  ;;  %3776 = vmatprep.subr.bf16.mxu0 %v5211_v28  ;;  %v5268_v27 = vld [vmem:[#allocation8 + $0x30c] ss:$16 sps:$4 sm:$0xff]   ;;  %v5263_v28 = vld [vmem:[#allocation8 + $0x300] ss:$16 sps:$4 sm:$0xff]  }
 0x23c   :  { %3940 = vmatprep.subr.bf16.mxu1 %v5214_v29  ;;  %v5266_v29 = vld [vmem:[#allocation8 + $0x308] ss:$16 sps:$4 sm:$0xff]  }
 0x23e   :  { %3777 = vmatpush1.bf16.msra.mxu0 %v5209_v30  ;;  %v5271_v30 = vld [vmem:[#allocation8 + $0x324] ss:$16 sps:$4 sm:$0xff]  }
 0x23f   :  { %3941 = vmatpush1.bf16.msra.mxu1 %v5212_v44  ;;  %3787 = vmatprep.subr.bf16.mxu0 %v5217_v32  ;;  %v5274_v44 = vld [vmem:[#allocation8 + $0x32c] ss:$16 sps:$4 sm:$0xff]   ;;  %v5269_v32 = vld [vmem:[#allocation8 + $0x320] ss:$16 sps:$4 sm:$0xff]  }
 0x240   :  { %3951 = vmatprep.subr.bf16.mxu1 %v5220_v33  ;;  %v5272_v33 = vld [vmem:[#allocation8 + $0x328] ss:$16 sps:$4 sm:$0xff]  }
 0x254   :  { %v1919_v39 = vpop.f32.mrb[4].mxu0  ;;  %v5865_v40 = vpop.f32.mrb[4].mxu1 }
 0x255   :  { %v5042_v41 = vadd.f32 %v1919_v39, %v527_v35  ;;  %v1921_v42 = vpop.f32.mrb[5].mxu0  ;;  %v2003_v4 = vpop.f32.mrb[5].mxu1  ;;  %v5277_v35 = vld [vmem:[#allocation8 + $0x344] ss:$16 sps:$4 sm:$0xff]   ;;  %v5278_v39 = vld [vmem:[#allocation8 + $0x348] ss:$16 sps:$4 sm:$0xff]  }
 0x256   :  { %v5043_v46 = vadd.f32 %v1921_v42, %v531_v37  ;;  %v5045_v43 = vadd.f32 %v2003_v4, %v539_v38  ;;  %v1923_v45 = vpop.f32.mrb[6].mxu0  ;;  %v2005_v47 = vpop.f32.mrb[6].mxu1  ;;  %v5280_v37 = vld [vmem:[#allocation8 + $0x34c] ss:$16 sps:$4 sm:$0xff]   ;;  %v5275_v38 = vld [vmem:[#allocation8 + $0x340] ss:$16 sps:$4 sm:$0xff]  }
 0x257   :  { %v2172_v48 = vmax.f32 %v5042_v41, 0.0  ;;  %v1924_v49 = vpop.f32.mrb[7].mxu0  ;;  %v2006_v50 = vpop.f32.mrb[7].mxu1  ;;  %v5283_v41 = vld [vmem:[#allocation8 + $0x364] ss:$16 sps:$4 sm:$0xff]  }
 0x258   :  { %v2173_v54 = vmax.f32 %v5043_v46, 0.0  ;;  %v2175_v51 = vmax.f32 %v5045_v43, 0.0  ;;  %v5286_v42 = vld [vmem:[#allocation8 + $0x36c] ss:$16 sps:$4 sm:$0xff]   ;;  %v5281_v4 = vld [vmem:[#allocation8 + $0x360] ss:$16 sps:$4 sm:$0xff]  }
 0x259   :  { %v2180_v56 = vpack.c.bf16 %v2172_v48, %v2172_v48  ;;  %v5284_v46 = vld [vmem:[#allocation8 + $0x368] ss:$16 sps:$4 sm:$0xff]   ;;  %v5289_v43 = vld [vmem:[#allocation8 + $0x384] ss:$16 sps:$4 sm:$0xff]   ;;  %v5292_v45 = vld [vmem:[#allocation8 + $0x38c] ss:$16 sps:$4 sm:$0xff]  }
 0x25a   :  { %v2181_v52 = vpack.c.bf16 %v2173_v54, %v2173_v54  ;;  %v2183_v58 = vpack.c.bf16 %v2175_v51, %v2175_v51  ;;  %v5287_v47 = vld [vmem:[#allocation8 + $0x380] ss:$16 sps:$4 sm:$0xff]   ;;  %v5290_v48 = vld [vmem:[#allocation8 + $0x388] ss:$16 sps:$4 sm:$0xff]   ;;  %v5295_v49 = vld [vmem:[#allocation8 + $0x3a4] ss:$16 sps:$4 sm:$0xff]  }
 0x25b   :  { %v5298_v50 = vld [vmem:[#allocation8 + $0x3ac] ss:$16 sps:$4 sm:$0xff]   ;;  %v5293_v54 = vld [vmem:[#allocation8 + $0x3a0] ss:$16 sps:$4 sm:$0xff]   ;;  %v5296_v51 = vld [vmem:[#allocation8 + $0x3a8] ss:$16 sps:$4 sm:$0xff]  }
 0x25c   :  { %3778 = vmatprep.mubr.bf16.mxu0 %v2181_v52  ;;  %3942 = vmatprep.mubr.bf16.mxu1 %v2181_v52  ;;  %v535_v52 = vrot.slane %v5857_v34, %v5837_v31 }
 0x25d   :  { %3779 = vmatmul.mubr.bf16.vlgmr.msra.gmra.mrb[12].mxu0 %v2180_v56  ;;  %3943 = vmatmul.mubr.bf16.vlgmr.msra.gmra.mrb[12].mxu1 %v2180_v56  ;;  %v5299_v56 = vld [vmem:[#allocation8 + $0x3c0] ss:$16 sps:$4 sm:$0xff]  }
 0x25e   :  { %3788 = vmatpush1.bf16.msra.mxu0 %v5215_v53  ;;  %3952 = vmatpush1.bf16.msra.mxu1 %v5218_v55  ;;  %v5301_v53 = vld [vmem:[#allocation8 + $0x3c4] ss:$16 sps:$4 sm:$0xff]   ;;  %v5304_v55 = vld [vmem:[#allocation8 + $0x3cc] ss:$16 sps:$4 sm:$0xff]  }
 0x25f   :  { %3819 = vmatprep.mubr.bf16.mxu0 %v2183_v58  ;;  %3983 = vmatprep.mubr.bf16.mxu1 %v2183_v58  ;;  %v5307_v58 = vld [vmem:[#allocation8 + $0x3e4] ss:$16 sps:$4 sm:$0xff]  }
 0x260   :  { %3789 = vmatprep.subr.bf16.mxu0 %v5223_v22  ;;  %3953 = vmatprep.subr.bf16.mxu1 %v5226_v57  ;;  %v5302_v22 = vld [vmem:[#allocation8 + $0x3c8] ss:$16 sps:$4 sm:$0xff]   ;;  %v5044_v57 = vadd.f32 %v5865_v40, %v535_v52  ;;  %v5319_v40 = vld [vmem:[#allocation8 + $0x424] ss:$16 sps:$4 sm:$0xff]   ;;  %v5377_v52 = vld [vmem:[#allocation8 + $0x560] ss:$16 sps:$4 sm:$0xff]  }
 0x262   :  { %3790 = vmatpush1.bf16.msra.mxu0 %v5221_v59  ;;  %3954 = vmatpush1.bf16.msra.mxu1 %v5224_v60  ;;  %v5310_v59 = vld [vmem:[#allocation8 + $0x3ec] ss:$16 sps:$4 sm:$0xff]   ;;  %v5305_v60 = vld [vmem:[#allocation8 + $0x3e0] ss:$16 sps:$4 sm:$0xff]  }
 0x263   :  { %3791 = vmatprep.subr.bf16.mxu0 %v5229_v61  ;;  %3955 = vmatprep.subr.bf16.mxu1 %v5232_v62  ;;  %v5308_v61 = vld [vmem:[#allocation8 + $0x3e8] ss:$16 sps:$4 sm:$0xff]   ;;  %v2174_v62 = vmax.f32 %v5044_v57, 0.0 }
 0x264   :  { %v5386_v57 = vld [vmem:[#allocation8 + $0x588] ss:$16 sps:$4 sm:$0xff]  }
 0x266   :  { %3792 = vmatpush1.bf16.msra.mxu0 %v5227_v63  ;;  %3956 = vmatpush1.bf16.msra.mxu1 %v5230_v0  ;;  %v5313_v63 = vld [vmem:[#allocation8 + $0x404] ss:$16 sps:$4 sm:$0xff]   ;;  %v5316_v0 = vld [vmem:[#allocation8 + $0x40c] ss:$16 sps:$4 sm:$0xff]  }
 0x267   :  { %3793 = vmatprep.subr.bf16.mxu0 %v5235_v1  ;;  %3957 = vmatprep.subr.bf16.mxu1 %v5238_v36  ;;  %v5311_v1 = vld [vmem:[#allocation8 + $0x400] ss:$16 sps:$4 sm:$0xff]   ;;  %v5314_v36 = vld [vmem:[#allocation8 + $0x408] ss:$16 sps:$4 sm:$0xff]  }
 0x26a   :  { %3794 = vmatpush1.bf16.msra.mxu0 %v5233_v2  ;;  %3958 = vmatpush1.bf16.msra.mxu1 %v5236_v3  ;;  %v2182_v2 = vpack.c.bf16 %v2174_v62, %v2174_v62  ;;  %v5322_v3 = vld [vmem:[#allocation8 + $0x42c] ss:$16 sps:$4 sm:$0xff]   ;;  %v5392_v62 = vld [vmem:[#allocation8 + $0x5a8] ss:$16 sps:$4 sm:$0xff]  }
 0x26b   :  { %3795 = vmatprep.subr.bf16.mxu0 %v5241_v5  ;;  %3959 = vmatprep.subr.bf16.mxu1 %v5244_v6  ;;  %v5317_v5 = vld [vmem:[#allocation8 + $0x420] ss:$16 sps:$4 sm:$0xff]   ;;  %v5320_v6 = vld [vmem:[#allocation8 + $0x428] ss:$16 sps:$4 sm:$0xff]  }
 0x26e   :  { %3796 = vmatpush1.bf16.msra.mxu0 %v5239_v7  ;;  %3960 = vmatpush1.bf16.msra.mxu1 %v5242_v8  ;;  %v5325_v7 = vld [vmem:[#allocation8 + $0x444] ss:$16 sps:$4 sm:$0xff]   ;;  %v5328_v8 = vld [vmem:[#allocation8 + $0x44c] ss:$16 sps:$4 sm:$0xff]  }
 0x26f   :  { %3797 = vmatprep.subr.bf16.mxu0 %v5247_v9  ;;  %3961 = vmatprep.subr.bf16.mxu1 %v5250_v10  ;;  %v5323_v9 = vld [vmem:[#allocation8 + $0x440] ss:$16 sps:$4 sm:$0xff]   ;;  %v5326_v10 = vld [vmem:[#allocation8 + $0x448] ss:$16 sps:$4 sm:$0xff]  }
 0x272   :  { %3798 = vmatpush1.bf16.msra.mxu0 %v5245_v11  ;;  %3962 = vmatpush1.bf16.msra.mxu1 %v5248_v12  ;;  %v5331_v11 = vld [vmem:[#allocation8 + $0x464] ss:$16 sps:$4 sm:$0xff]   ;;  %v5334_v12 = vld [vmem:[#allocation8 + $0x46c] ss:$16 sps:$4 sm:$0xff]  }
 0x273   :  { %3799 = vmatprep.subr.bf16.mxu0 %v5253_v13  ;;  %3963 = vmatprep.subr.bf16.mxu1 %v5256_v14  ;;  %v5329_v13 = vld [vmem:[#allocation8 + $0x460] ss:$16 sps:$4 sm:$0xff]   ;;  %v5332_v14 = vld [vmem:[#allocation8 + $0x468] ss:$16 sps:$4 sm:$0xff]  }
 0x276   :  { %3800 = vmatpush1.bf16.msra.mxu0 %v5251_v15  ;;  %3964 = vmatpush1.bf16.msra.mxu1 %v5254_v16  ;;  %v5337_v15 = vld [vmem:[#allocation8 + $0x484] ss:$16 sps:$4 sm:$0xff]   ;;  %v5340_v16 = vld [vmem:[#allocation8 + $0x48c] ss:$16 sps:$4 sm:$0xff]  }
 0x277   :  { %3801 = vmatprep.subr.bf16.mxu0 %v5259_v17  ;;  %3965 = vmatprep.subr.bf16.mxu1 %v5262_v18  ;;  %v5335_v17 = vld [vmem:[#allocation8 + $0x480] ss:$16 sps:$4 sm:$0xff]   ;;  %v5338_v18 = vld [vmem:[#allocation8 + $0x488] ss:$16 sps:$4 sm:$0xff]  }
 0x27a   :  { %3802 = vmatpush1.bf16.msra.mxu0 %v5257_v19  ;;  %3966 = vmatpush1.bf16.msra.mxu1 %v5260_v24  ;;  %v5343_v19 = vld [vmem:[#allocation8 + $0x4a4] ss:$16 sps:$4 sm:$0xff]   ;;  %v5346_v24 = vld [vmem:[#allocation8 + $0x4ac] ss:$16 sps:$4 sm:$0xff]  }
 0x27b   :  { %3803 = vmatprep.subr.bf16.mxu0 %v5265_v26  ;;  %3967 = vmatprep.subr.bf16.mxu1 %v5268_v27  ;;  %v5341_v26 = vld [vmem:[#allocation8 + $0x4a0] ss:$16 sps:$4 sm:$0xff]   ;;  %v5344_v27 = vld [vmem:[#allocation8 + $0x4a8] ss:$16 sps:$4 sm:$0xff]  }
 0x27e   :  { %3804 = vmatpush1.bf16.msra.mxu0 %v5263_v28  ;;  %3968 = vmatpush1.bf16.msra.mxu1 %v5266_v29  ;;  %v5349_v28 = vld [vmem:[#allocation8 + $0x4c4] ss:$16 sps:$4 sm:$0xff]   ;;  %v5352_v29 = vld [vmem:[#allocation8 + $0x4cc] ss:$16 sps:$4 sm:$0xff]  }
 0x27f   :  { %3805 = vmatprep.subr.bf16.mxu0 %v5271_v30  ;;  %3969 = vmatprep.subr.bf16.mxu1 %v5274_v44  ;;  %v5347_v30 = vld [vmem:[#allocation8 + $0x4c0] ss:$16 sps:$4 sm:$0xff]   ;;  %v5350_v44 = vld [vmem:[#allocation8 + $0x4c8] ss:$16 sps:$4 sm:$0xff]  }
 0x282   :  { %3806 = vmatpush1.bf16.msra.mxu0 %v5269_v32  ;;  %3970 = vmatpush1.bf16.msra.mxu1 %v5272_v33  ;;  %v5355_v32 = vld [vmem:[#allocation8 + $0x4e4] ss:$16 sps:$4 sm:$0xff]   ;;  %v5358_v33 = vld [vmem:[#allocation8 + $0x4ec] ss:$16 sps:$4 sm:$0xff]  }
 0x283   :  { %3807 = vmatprep.subr.bf16.mxu0 %v5277_v35  ;;  %3971 = vmatprep.subr.bf16.mxu1 %v5280_v37  ;;  %v5353_v35 = vld [vmem:[#allocation8 + $0x4e0] ss:$16 sps:$4 sm:$0xff]   ;;  %v5356_v37 = vld [vmem:[#allocation8 + $0x4e8] ss:$16 sps:$4 sm:$0xff]  }
 0x286   :  { %3808 = vmatpush1.bf16.msra.mxu0 %v5275_v38  ;;  %3972 = vmatpush1.bf16.msra.mxu1 %v5278_v39  ;;  %v5361_v38 = vld [vmem:[#allocation8 + $0x504] ss:$16 sps:$4 sm:$0xff]   ;;  %v5364_v39 = vld [vmem:[#allocation8 + $0x50c] ss:$16 sps:$4 sm:$0xff]  }
 0x287   :  { %3809 = vmatprep.subr.bf16.mxu0 %v5283_v41  ;;  %3973 = vmatprep.subr.bf16.mxu1 %v5286_v42  ;;  %v5359_v41 = vld [vmem:[#allocation8 + $0x500] ss:$16 sps:$4 sm:$0xff]   ;;  %v5362_v42 = vld [vmem:[#allocation8 + $0x508] ss:$16 sps:$4 sm:$0xff]  }
 0x28a   :  { %3810 = vmatpush1.bf16.msra.mxu0 %v5281_v4  ;;  %3974 = vmatpush1.bf16.msra.mxu1 %v5284_v46  ;;  %v5367_v4 = vld [vmem:[#allocation8 + $0x524] ss:$16 sps:$4 sm:$0xff]   ;;  %v5370_v46 = vld [vmem:[#allocation8 + $0x52c] ss:$16 sps:$4 sm:$0xff]  }
 0x28b   :  { %3811 = vmatprep.subr.bf16.mxu0 %v5289_v43  ;;  %3975 = vmatprep.subr.bf16.mxu1 %v5292_v45  ;;  %v5365_v43 = vld [vmem:[#allocation8 + $0x520] ss:$16 sps:$4 sm:$0xff]   ;;  %v5368_v45 = vld [vmem:[#allocation8 + $0x528] ss:$16 sps:$4 sm:$0xff]  }
 0x28e   :  { %3812 = vmatpush1.bf16.msra.mxu0 %v5287_v47  ;;  %3976 = vmatpush1.bf16.msra.mxu1 %v5290_v48  ;;  %v5373_v47 = vld [vmem:[#allocation8 + $0x544] ss:$16 sps:$4 sm:$0xff]   ;;  %v5376_v48 = vld [vmem:[#allocation8 + $0x54c] ss:$16 sps:$4 sm:$0xff]  }
 0x28f   :  { %3813 = vmatprep.subr.bf16.mxu0 %v5295_v49  ;;  %3977 = vmatprep.subr.bf16.mxu1 %v5298_v50  ;;  %v5371_v49 = vld [vmem:[#allocation8 + $0x540] ss:$16 sps:$4 sm:$0xff]   ;;  %v5374_v50 = vld [vmem:[#allocation8 + $0x548] ss:$16 sps:$4 sm:$0xff]  }
 0x292   :  { %3814 = vmatpush1.bf16.msra.mxu0 %v5293_v54  ;;  %3978 = vmatpush1.bf16.msra.mxu1 %v5296_v51  ;;  %v5379_v54 = vld [vmem:[#allocation8 + $0x564] ss:$16 sps:$4 sm:$0xff]   ;;  %v5382_v51 = vld [vmem:[#allocation8 + $0x56c] ss:$16 sps:$4 sm:$0xff]  }
 0x293   :  { %3815 = vmatprep.subr.bf16.mxu0 %v5301_v53  ;;  %3979 = vmatprep.subr.bf16.mxu1 %v5304_v55  ;;  %v5380_v53 = vld [vmem:[#allocation8 + $0x568] ss:$16 sps:$4 sm:$0xff]   ;;  %v5385_v55 = vld [vmem:[#allocation8 + $0x584] ss:$16 sps:$4 sm:$0xff]  }
 0x296   :  { %3816 = vmatpush1.bf16.msra.mxu0 %v5299_v56  ;;  %3980 = vmatpush1.bf16.msra.mxu1 %v5302_v22  ;;  %v5388_v56 = vld [vmem:[#allocation8 + $0x58c] ss:$16 sps:$4 sm:$0xff]   ;;  %v5383_v22 = vld [vmem:[#allocation8 + $0x580] ss:$16 sps:$4 sm:$0xff]  }
 0x297   :  { %3817 = vmatprep.subr.bf16.mxu0 %v5307_v58  ;;  %3981 = vmatprep.subr.bf16.mxu1 %v5310_v59  ;;  %v5391_v58 = vld [vmem:[#allocation8 + $0x5a4] ss:$16 sps:$4 sm:$0xff]   ;;  %v5394_v59 = vld [vmem:[#allocation8 + $0x5ac] ss:$16 sps:$4 sm:$0xff]  }
 0x29a   :  { %3818 = vmatpush1.bf16.msra.mxu0 %v5305_v60  ;;  %3982 = vmatpush1.bf16.msra.mxu1 %v5308_v61  ;;  %v542_v60 = vsub.s32 4, %v5800_v20  ;;  %v5389_v61 = vld [vmem:[#allocation8 + $0x5a0] ss:$16 sps:$4 sm:$0xff]  }
 0x29b   :  { %3828 = vmatprep.subr.bf16.mxu0 %v5313_v63  ;;  %3992 = vmatprep.subr.bf16.mxu1 %v5316_v0  ;;  %v546_v63 = vsub.s32 5, %v5800_v20  ;;  %v5397_v0 = vld [vmem:[#allocation8 + $0x5c4] ss:$16 sps:$4 sm:$0xff]  }
 0x29d   :  { %3820 = vmatmul.mubr.bf16.vlgmr.msra.gmra.mrb[12].mxu0 %v2182_v2  ;;  %3984 = vmatmul.mubr.bf16.vlgmr.msra.gmra.mrb[12].mxu1 %v2182_v2  ;;  %v543_v2 = vrot.slane %v5857_v34, %v542_v60  ;;  %v5448_v60 = vld [vmem:[#allocation8 + $0x6cc] ss:$16 sps:$4 sm:$0xff]  }
 0x29e   :  { %3829 = vmatpush1.bf16.msra.mxu0 %v5311_v1  ;;  %3993 = vmatpush1.bf16.msra.mxu1 %v5314_v36  ;;  %v5400_v1 = vld [vmem:[#allocation8 + $0x5cc] ss:$16 sps:$4 sm:$0xff]   ;;  %v554_v36 = vsub.s32 7, %v5800_v20 }
 0x29f   :  { %3830 = vmatprep.subr.bf16.mxu0 %v5319_v40  ;;  %3994 = vmatprep.subr.bf16.mxu1 %v5322_v3  ;;  %v5395_v40 = vld [vmem:[#allocation8 + $0x5c0] ss:$16 sps:$4 sm:$0xff]   ;;  %v5398_v3 = vld [vmem:[#allocation8 + $0x5c8] ss:$16 sps:$4 sm:$0xff]  }
 0x2a2   :  { %3831 = vmatpush1.bf16.msra.mxu0 %v5317_v5  ;;  %3995 = vmatpush1.bf16.msra.mxu1 %v5320_v6  ;;  %v547_v5 = vrot.slane %v5857_v34, %v546_v63  ;;  %v555_v6 = vrot.slane %v5857_v34, %v554_v36  ;;  %v5451_v63 = vld [vmem:[#allocation8 + $0x6e4] ss:$16 sps:$4 sm:$0xff]   ;;  %v5452_v36 = vld [vmem:[#allocation8 + $0x6e8] ss:$16 sps:$4 sm:$0xff]  }
 0x2a3   :  { %3832 = vmatprep.subr.bf16.mxu0 %v5325_v7  ;;  %3996 = vmatprep.subr.bf16.mxu1 %v5328_v8  ;;  %v5403_v7 = vld [vmem:[#allocation8 + $0x5e4] ss:$16 sps:$4 sm:$0xff]   ;;  %v5406_v8 = vld [vmem:[#allocation8 + $0x5ec] ss:$16 sps:$4 sm:$0xff]  }
 0x2a6   :  { %3833 = vmatpush1.bf16.msra.mxu0 %v5323_v9  ;;  %3997 = vmatpush1.bf16.msra.mxu1 %v5326_v10 }
 0x2a7   :  { %3834 = vmatprep.subr.bf16.mxu0 %v5331_v11  ;;  %3998 = vmatprep.subr.bf16.mxu1 %v5334_v12 }
 0x2aa   :  { %3835 = vmatpush1.bf16.msra.mxu0 %v5329_v13  ;;  %3999 = vmatpush1.bf16.msra.mxu1 %v5332_v14  ;;  %v5401_v13 = vld [vmem:[#allocation8 + $0x5e0] ss:$16 sps:$4 sm:$0xff]  }
 0x2ab   :  { %3836 = vmatprep.subr.bf16.mxu0 %v5337_v15  ;;  %4000 = vmatprep.subr.bf16.mxu1 %v5340_v16 }
 0x2ae   :  { %3837 = vmatpush1.bf16.msra.mxu0 %v5335_v17  ;;  %4001 = vmatpush1.bf16.msra.mxu1 %v5338_v18  ;;  %v5404_v17 = vld [vmem:[#allocation8 + $0x5e8] ss:$16 sps:$4 sm:$0xff]   ;;  %v5409_v18 = vld [vmem:[#allocation8 + $0x604] ss:$16 sps:$4 sm:$0xff]  }
 0x2af   :  { %3838 = vmatprep.subr.bf16.mxu0 %v5343_v19  ;;  %4002 = vmatprep.subr.bf16.mxu1 %v5346_v24 }
 0x2b2   :  { %3839 = vmatpush1.bf16.msra.mxu0 %v5341_v26  ;;  %4003 = vmatpush1.bf16.msra.mxu1 %v5344_v27 }
 0x2b3   :  { %3840 = vmatprep.subr.bf16.mxu0 %v5349_v28  ;;  %4004 = vmatprep.subr.bf16.mxu1 %v5352_v29  ;;  %v5412_v28 = vld [vmem:[#allocation8 + $0x60c] ss:$16 sps:$4 sm:$0xff]  }
 0x2b6   :  { %3841 = vmatpush1.bf16.msra.mxu0 %v5347_v30  ;;  %4005 = vmatpush1.bf16.msra.mxu1 %v5350_v44 }
 0x2b7   :  { %3842 = vmatprep.subr.bf16.mxu0 %v5355_v32  ;;  %4006 = vmatprep.subr.bf16.mxu1 %v5358_v33  ;;  %v5407_v33 = vld [vmem:[#allocation8 + $0x600] ss:$16 sps:$4 sm:$0xff]  }
 0x2ba   :  { %3843 = vmatpush1.bf16.msra.mxu0 %v5353_v35  ;;  %4007 = vmatpush1.bf16.msra.mxu1 %v5356_v37  ;;  %v5410_v35 = vld [vmem:[#allocation8 + $0x608] ss:$16 sps:$4 sm:$0xff]  }
 0x2bb   :  { %3844 = vmatprep.subr.bf16.mxu0 %v5361_v38  ;;  %4008 = vmatprep.subr.bf16.mxu1 %v5364_v39  ;;  %v5415_v38 = vld [vmem:[#allocation8 + $0x624] ss:$16 sps:$4 sm:$0xff]   ;;  %v5418_v39 = vld [vmem:[#allocation8 + $0x62c] ss:$16 sps:$4 sm:$0xff]  }
 0x2be   :  { %3845 = vmatpush1.bf16.msra.mxu0 %v5359_v41  ;;  %4009 = vmatpush1.bf16.msra.mxu1 %v5362_v42  ;;  %v5413_v42 = vld [vmem:[#allocation8 + $0x620] ss:$16 sps:$4 sm:$0xff]  }
 0x2bf   :  { %3846 = vmatprep.subr.bf16.mxu0 %v5367_v4  ;;  %4010 = vmatprep.subr.bf16.mxu1 %v5370_v46  ;;  %v5416_v4 = vld [vmem:[#allocation8 + $0x628] ss:$16 sps:$4 sm:$0xff]   ;;  %v5421_v46 = vld [vmem:[#allocation8 + $0x644] ss:$16 sps:$4 sm:$0xff]  }
 0x2c2   :  { %3847 = vmatpush1.bf16.msra.mxu0 %v5365_v43  ;;  %4011 = vmatpush1.bf16.msra.mxu1 %v5368_v45  ;;  %v5424_v43 = vld [vmem:[#allocation8 + $0x64c] ss:$16 sps:$4 sm:$0xff]   ;;  %v5419_v45 = vld [vmem:[#allocation8 + $0x640] ss:$16 sps:$4 sm:$0xff]  }
 0x2c3   :  { %3848 = vmatprep.subr.bf16.mxu0 %v5373_v47  ;;  %4012 = vmatprep.subr.bf16.mxu1 %v5376_v48  ;;  %v5422_v47 = vld [vmem:[#allocation8 + $0x648] ss:$16 sps:$4 sm:$0xff]   ;;  %v5427_v48 = vld [vmem:[#allocation8 + $0x664] ss:$16 sps:$4 sm:$0xff]  }
 0x2c6   :  { %3849 = vmatpush1.bf16.msra.mxu0 %v5371_v49  ;;  %4013 = vmatpush1.bf16.msra.mxu1 %v5374_v50  ;;  %v5430_v49 = vld [vmem:[#allocation8 + $0x66c] ss:$16 sps:$4 sm:$0xff]   ;;  %v5425_v50 = vld [vmem:[#allocation8 + $0x660] ss:$16 sps:$4 sm:$0xff]  }
 0x2c7   :  { %3850 = vmatprep.subr.bf16.mxu0 %v5379_v54  ;;  %4014 = vmatprep.subr.bf16.mxu1 %v5382_v51  ;;  %v5428_v54 = vld [vmem:[#allocation8 + $0x668] ss:$16 sps:$4 sm:$0xff]   ;;  %v5433_v51 = vld [vmem:[#allocation8 + $0x684] ss:$16 sps:$4 sm:$0xff]  }
 0x2ca   :  { %3851 = vmatpush1.bf16.msra.mxu0 %v5377_v52  ;;  %4015 = vmatpush1.bf16.msra.mxu1 %v5380_v53  ;;  %v5436_v52 = vld [vmem:[#allocation8 + $0x68c] ss:$16 sps:$4 sm:$0xff]   ;;  %v5431_v53 = vld [vmem:[#allocation8 + $0x680] ss:$16 sps:$4 sm:$0xff]  }
 0x2cb   :  { %3852 = vmatprep.subr.bf16.mxu0 %v5385_v55  ;;  %4016 = vmatprep.subr.bf16.mxu1 %v5388_v56  ;;  %v5434_v55 = vld [vmem:[#allocation8 + $0x688] ss:$16 sps:$4 sm:$0xff]   ;;  %v5439_v56 = vld [vmem:[#allocation8 + $0x6a4] ss:$16 sps:$4 sm:$0xff]  }
 0x2ce   :  { %3853 = vmatpush1.bf16.msra.mxu0 %v5383_v22  ;;  %4017 = vmatpush1.bf16.msra.mxu1 %v5386_v57  ;;  %v5442_v22 = vld [vmem:[#allocation8 + $0x6ac] ss:$16 sps:$4 sm:$0xff]   ;;  %v5437_v57 = vld [vmem:[#allocation8 + $0x6a0] ss:$16 sps:$4 sm:$0xff]  }
 0x2cf   :  { %3854 = vmatprep.subr.bf16.mxu0 %v5391_v58  ;;  %4018 = vmatprep.subr.bf16.mxu1 %v5394_v59  ;;  %v5440_v58 = vld [vmem:[#allocation8 + $0x6a8] ss:$16 sps:$4 sm:$0xff]   ;;  %v5445_v59 = vld [vmem:[#allocation8 + $0x6c4] ss:$16 sps:$4 sm:$0xff]  }
 0x2d2   :  { %3855 = vmatpush1.bf16.msra.mxu0 %v5389_v61  ;;  %4019 = vmatpush1.bf16.msra.mxu1 %v5392_v62  ;;  %v5443_v61 = vld [vmem:[#allocation8 + $0x6c0] ss:$16 sps:$4 sm:$0xff]   ;;  %v5446_v62 = vld [vmem:[#allocation8 + $0x6c8] ss:$16 sps:$4 sm:$0xff]  }
 0x2d3   :  { %3856 = vmatprep.subr.bf16.mxu0 %v5397_v0  ;;  %4020 = vmatprep.subr.bf16.mxu1 %v5400_v1  ;;  %v5454_v0 = vld [vmem:[#allocation8 + $0x6ec] ss:$16 sps:$4 sm:$0xff]   ;;  %v5449_v1 = vld [vmem:[#allocation8 + $0x6e0] ss:$16 sps:$4 sm:$0xff]  }
 0x2d4   :  { %v2083_v9 = vpop.f32.mrb[8].mxu0 }
 0x2d5   :  { %v5046_v10 = vadd.f32 %v2083_v9, %v543_v2  ;;  %v5876_v11 = vpop.f32.mrb[8].mxu1  ;;  %v2085_v12 = vpop.f32.mrb[9].mxu0  ;;  %v5457_v2 = vld [vmem:[#allocation8 + $0x704] ss:$16 sps:$4 sm:$0xff]   ;;  %v5464_v9 = vld [vmem:[#allocation8 + $0x728] ss:$16 sps:$4 sm:$0xff]  }
 0x2d6   :  { %v5047_v14 = vadd.f32 %v2085_v12, %v547_v5  ;;  %v2167_v15 = vpop.f32.mrb[9].mxu1  ;;  %3857 = vmatpush1.bf16.msra.mxu0 %v5395_v40  ;;  %4021 = vmatpush1.bf16.msra.mxu1 %v5398_v3  ;;  %v2087_v16 = vpop.f32.mrb[10].mxu0  ;;  %v5460_v40 = vld [vmem:[#allocation8 + $0x70c] ss:$16 sps:$4 sm:$0xff]   ;;  %v5455_v3 = vld [vmem:[#allocation8 + $0x700] ss:$16 sps:$4 sm:$0xff]  }
 0x2d7   :  { %v2176_v19 = vmax.f32 %v5046_v10, 0.0  ;;  %v5049_v24 = vadd.f32 %v2167_v15, %v555_v6  ;;  %v2169_v26 = vpop.f32.mrb[10].mxu1  ;;  %v2088_v27 = vpop.f32.mrb[11].mxu0  ;;  %3858 = vmatprep.subr.bf16.mxu0 %v5403_v7  ;;  %4022 = vmatprep.subr.bf16.mxu1 %v5406_v8  ;;  %v5458_v5 = vld [vmem:[#allocation8 + $0x708] ss:$16 sps:$4 sm:$0xff]  }
 0x2d8   :  { %v2177_v29 = vmax.f32 %v5047_v14, 0.0  ;;  %v2170_v30 = vpop.f32.mrb[11].mxu1  ;;  %v5463_v6 = vld [vmem:[#allocation8 + $0x724] ss:$16 sps:$4 sm:$0xff]   ;;  %v5466_v7 = vld [vmem:[#allocation8 + $0x72c] ss:$16 sps:$4 sm:$0xff]  }
 0x2d9   :  { %v2179_v44 = vmax.f32 %v5049_v24, 0.0  ;;  %v2184_v37 = vpack.c.bf16 %v2176_v19, %v2176_v19  ;;  %v5461_v8 = vld [vmem:[#allocation8 + $0x720] ss:$16 sps:$4 sm:$0xff]   ;;  %v5469_v10 = vld [vmem:[#allocation8 + $0x744] ss:$16 sps:$4 sm:$0xff]  }
 0x2da   :  { %v2185_v32 = vpack.c.bf16 %v2177_v29, %v2177_v29  ;;  %3859 = vmatpush1.bf16.msra.mxu0 %v5401_v13  ;;  %4023 = vmatpush1.bf16.msra.mxu1 %v5404_v17  ;;  %v5472_v12 = vld [vmem:[#allocation8 + $0x74c] ss:$16 sps:$4 sm:$0xff]   ;;  %v5467_v13 = vld [vmem:[#allocation8 + $0x740] ss:$16 sps:$4 sm:$0xff]   ;;  %v5470_v14 = vld [vmem:[#allocation8 + $0x748] ss:$16 sps:$4 sm:$0xff]  }
 0x2db   :  { %3869 = vmatprep.subr.bf16.mxu0 %v5409_v18  ;;  %4033 = vmatprep.subr.bf16.mxu1 %v5412_v28  ;;  %v2187_v41 = vpack.c.bf16 %v2179_v44, %v2179_v44  ;;  %v5475_v15 = vld [vmem:[#allocation8 + $0x764] ss:$16 sps:$4 sm:$0xff]   ;;  %v5478_v16 = vld [vmem:[#allocation8 + $0x76c] ss:$16 sps:$4 sm:$0xff]   ;;  %v5473_v17 = vld [vmem:[#allocation8 + $0x760] ss:$16 sps:$4 sm:$0xff]  }
 0x2dc   :  { %3860 = vmatprep.mubr.bf16.mxu0 %v2185_v32  ;;  %4024 = vmatprep.mubr.bf16.mxu1 %v2185_v32  ;;  %v5476_v18 = vld [vmem:[#allocation8 + $0x768] ss:$16 sps:$4 sm:$0xff]   ;;  %v5481_v19 = vld [vmem:[#allocation8 + $0x784] ss:$16 sps:$4 sm:$0xff]   ;;  %v5484_v24 = vld [vmem:[#allocation8 + $0x78c] ss:$16 sps:$4 sm:$0xff]  }
 0x2dd   :  { %3861 = vmatmul.mubr.bf16.vlgmr.msra.gmra.mrb[12].mxu0 %v2184_v37  ;;  %4025 = vmatmul.mubr.bf16.vlgmr.msra.gmra.mrb[12].mxu1 %v2184_v37  ;;  %v5479_v26 = vld [vmem:[#allocation8 + $0x780] ss:$16 sps:$4 sm:$0xff]   ;;  %v5482_v27 = vld [vmem:[#allocation8 + $0x788] ss:$16 sps:$4 sm:$0xff]   ;;  %v550_v28 = vsub.s32 6, %v5800_v20 }
 0x2de   :  { %3870 = vmatpush1.bf16.msra.mxu0 %v5407_v33  ;;  %4034 = vmatpush1.bf16.msra.mxu1 %v5410_v35  ;;  %v5487_v29 = vld [vmem:[#allocation8 + $0x7a4] ss:$16 sps:$4 sm:$0xff]   ;;  %v5490_v30 = vld [vmem:[#allocation8 + $0x7ac] ss:$16 sps:$4 sm:$0xff]   ;;  %v5485_v44 = vld [vmem:[#allocation8 + $0x7a0] ss:$16 sps:$4 sm:$0xff]  }
 0x2df   :  { %3901 = vmatprep.mubr.bf16.mxu0 %v2187_v41  ;;  %4065 = vmatprep.mubr.bf16.mxu1 %v2187_v41  ;;  %v5488_v32 = vld [vmem:[#allocation8 + $0x7a8] ss:$16 sps:$4 sm:$0xff]   ;;  %v551_v33 = vrot.slane %v5857_v34, %v550_v28  ;;  %v5493_v35 = vld [vmem:[#allocation8 + $0x7c4] ss:$16 sps:$4 sm:$0xff]   ;;  %v5496_v37 = vld [vmem:[#allocation8 + $0x7cc] ss:$16 sps:$4 sm:$0xff]  }
 0x2e0   :  { %3871 = vmatprep.subr.bf16.mxu0 %v5415_v38  ;;  %4035 = vmatprep.subr.bf16.mxu1 %v5418_v39  ;;  %v5491_v38 = vld [vmem:[#allocation8 + $0x7c0] ss:$16 sps:$4 sm:$0xff]   ;;  %v5494_v39 = vld [vmem:[#allocation8 + $0x7c8] ss:$16 sps:$4 sm:$0xff]   ;;  %v5499_v41 = vld [vmem:[#allocation8 + $0x7e4] ss:$16 sps:$4 sm:$0xff]  }
 0x2e1   :  { %v5048_v20 = vadd.f32 %v5876_v11, %v551_v33  ;;  %v5503_v34 = vld [vmem:[#allocation10 + $0x40] sm:$0xff]   ;;  %v5507_v11 = vld [vmem:[#allocation10 + $0x48] sm:$0xff]  }
 0x2e2   :  { %3872 = vmatpush1.bf16.msra.mxu0 %v5413_v42  ;;  %4036 = vmatpush1.bf16.msra.mxu1 %v5416_v4  ;;  %v5502_v42 = vld [vmem:[#allocation8 + $0x7ec] ss:$16 sps:$4 sm:$0xff]   ;;  %v5497_v4 = vld [vmem:[#allocation8 + $0x7e0] ss:$16 sps:$4 sm:$0xff]  }
 0x2e3   :  { %3873 = vmatprep.subr.bf16.mxu0 %v5421_v46  ;;  %4037 = vmatprep.subr.bf16.mxu1 %v5424_v43  ;;  %v5500_v46 = vld [vmem:[#allocation8 + $0x7e8] ss:$16 sps:$4 sm:$0xff]   ;;  %v2178_v43 = vmax.f32 %v5048_v20, 0.0 }
 0x2e6   :  { %3874 = vmatpush1.bf16.msra.mxu0 %v5419_v45  ;;  %4038 = vmatpush1.bf16.msra.mxu1 %v5422_v47  ;;  %v5504_v45 = vld [vmem:[#allocation10 + $0xc0] sm:$0xff]  }
 0x2e7   :  { %3875 = vmatprep.subr.bf16.mxu0 %v5427_v48  ;;  %4039 = vmatprep.subr.bf16.mxu1 %v5430_v49  ;;  %v5505_v47 = vld [vmem:[#allocation10] sm:$0xff]   ;;  %v2186_v49 = vpack.c.bf16 %v2178_v43, %v2178_v43 }
 0x2e8   :  { %v5506_v48 = vld [vmem:[#allocation10 + $0x80] sm:$0xff]  }
 0x2ea   :  { %3876 = vmatpush1.bf16.msra.mxu0 %v5425_v50  ;;  %4040 = vmatpush1.bf16.msra.mxu1 %v5428_v54  ;;  %v5508_v50 = vld [vmem:[#allocation10 + $0xc8] sm:$0xff]  }
 0x2eb   :  { %3877 = vmatprep.subr.bf16.mxu0 %v5433_v51  ;;  %4041 = vmatprep.subr.bf16.mxu1 %v5436_v52  ;;  %v5509_v54 = vld [vmem:[#allocation10 + $0x8] sm:$0xff]   ;;  %v5511_v52 = vld [vmem:[#allocation10 + $0x50] sm:$0xff]  }
 0x2ec   :  { %v5510_v51 = vld [vmem:[#allocation10 + $0x88] sm:$0xff]  }
 0x2ee   :  { %3878 = vmatpush1.bf16.msra.mxu0 %v5431_v53  ;;  %4042 = vmatpush1.bf16.msra.mxu1 %v5434_v55  ;;  %v5512_v53 = vld [vmem:[#allocation10 + $0xd0] sm:$0xff]  }
 0x2ef   :  { %3879 = vmatprep.subr.bf16.mxu0 %v5439_v56  ;;  %4043 = vmatprep.subr.bf16.mxu1 %v5442_v22  ;;  %v5513_v55 = vld [vmem:[#allocation10 + $0x10] sm:$0xff]   ;;  %v5515_v22 = vld [vmem:[#allocation10 + $0x58] sm:$0xff]  }
 0x2f0   :  { %v5514_v56 = vld [vmem:[#allocation10 + $0x90] sm:$0xff]  }
 0x2f2   :  { %3880 = vmatpush1.bf16.msra.mxu0 %v5437_v57  ;;  %4044 = vmatpush1.bf16.msra.mxu1 %v5440_v58  ;;  %v5516_v57 = vld [vmem:[#allocation10 + $0xd8] sm:$0xff]  }
 0x2f3   :  { %3881 = vmatprep.subr.bf16.mxu0 %v5445_v59  ;;  %4045 = vmatprep.subr.bf16.mxu1 %v5448_v60  ;;  %v5517_v58 = vld [vmem:[#allocation10 + $0x18] sm:$0xff]   ;;  %v5519_v60 = vld [vmem:[#allocation10 + $0x60] sm:$0xff]  }
 0x2f4   :  { %v5518_v59 = vld [vmem:[#allocation10 + $0x98] sm:$0xff]  }
 0x2f6   :  { %3882 = vmatpush1.bf16.msra.mxu0 %v5443_v61  ;;  %4046 = vmatpush1.bf16.msra.mxu1 %v5446_v62  ;;  %v5520_v61 = vld [vmem:[#allocation10 + $0xe0] sm:$0xff]  }
 0x2f7   :  { %3883 = vmatprep.subr.bf16.mxu0 %v5451_v63  ;;  %4047 = vmatprep.subr.bf16.mxu1 %v5454_v0  ;;  %v5521_v62 = vld [vmem:[#allocation10 + $0x20] sm:$0xff]   ;;  %v5523_v0 = vld [vmem:[#allocation10 + $0x68] sm:$0xff]  }
 0x2f8   :  { %v5522_v63 = vld [vmem:[#allocation10 + $0xa0] sm:$0xff]  }
 0x2fa   :  { %3884 = vmatpush1.bf16.msra.mxu0 %v5449_v1  ;;  %4048 = vmatpush1.bf16.msra.mxu1 %v5452_v36  ;;  %v5524_v1 = vld [vmem:[#allocation10 + $0xe8] sm:$0xff]  }
 0x2fb   :  { %3885 = vmatprep.subr.bf16.mxu0 %v5457_v2  ;;  %4049 = vmatprep.subr.bf16.mxu1 %v5460_v40  ;;  %v5525_v36 = vld [vmem:[#allocation10 + $0x28] sm:$0xff]   ;;  %v5527_v40 = vld [vmem:[#allocation10 + $0x70] sm:$0xff]  }
 0x2fc   :  { %v5526_v2 = vld [vmem:[#allocation10 + $0xa8] sm:$0xff]  }
 0x2fe   :  { %3886 = vmatpush1.bf16.msra.mxu0 %v5455_v3  ;;  %4050 = vmatpush1.bf16.msra.mxu1 %v5458_v5  ;;  %v5528_v3 = vld [vmem:[#allocation10 + $0xf0] sm:$0xff]  }
 0x2ff   :  { %3887 = vmatprep.subr.bf16.mxu0 %v5463_v6  ;;  %4051 = vmatprep.subr.bf16.mxu1 %v5466_v7  ;;  %v5529_v5 = vld [vmem:[#allocation10 + $0x30] sm:$0xff]   ;;  %v5531_v7 = vld [vmem:[#allocation10 + $0x78] sm:$0xff]  }
 0x300   :  { %v5530_v6 = vld [vmem:[#allocation10 + $0xb0] sm:$0xff]  }
 0x302   :  { %3888 = vmatpush1.bf16.msra.mxu0 %v5461_v8  ;;  %4052 = vmatpush1.bf16.msra.mxu1 %v5464_v9  ;;  %v5532_v8 = vld [vmem:[#allocation10 + $0xf8] sm:$0xff]  }
 0x303   :  { %3889 = vmatprep.subr.bf16.mxu0 %v5469_v10  ;;  %4053 = vmatprep.subr.bf16.mxu1 %v5472_v12  ;;  %v5533_v9 = vld [vmem:[#allocation10 + $0x38] sm:$0xff]  }
 0x304   :  { %v5534_v10 = vld [vmem:[#allocation10 + $0xb8] sm:$0xff]  }
 0x305   :  { %v2444_v12 = vld [vmem:[%s5909_s6] sm:$0xf] }
 0x306   :  { %3890 = vmatpush1.bf16.msra.mxu0 %v5467_v13  ;;  %4054 = vmatpush1.bf16.msra.mxu1 %v5470_v14  ;;  %v2449_v13 = vrot.slane %v2444_v12, %v5803_v21  ;;  %v2457_v14 = vrot.slane %v2444_v12, %v5837_v31 }
 0x307   :  { %3891 = vmatprep.subr.bf16.mxu0 %v5475_v15  ;;  %4055 = vmatprep.subr.bf16.mxu1 %v5478_v16  ;;  %v2453_v15 = vrot.slane %v2444_v12, %v5811_v23  ;;  %v2461_v16 = vrot.slane %v2444_v12, %v5816_v25 }
 0x30a   :  { %3892 = vmatpush1.bf16.msra.mxu0 %v5473_v17  ;;  %4056 = vmatpush1.bf16.msra.mxu1 %v5476_v18 }
 0x30b   :  { %3893 = vmatprep.subr.bf16.mxu0 %v5481_v19  ;;  %4057 = vmatprep.subr.bf16.mxu1 %v5484_v24 }
 0x30e   :  { %3894 = vmatpush1.bf16.msra.mxu0 %v5479_v26  ;;  %4058 = vmatpush1.bf16.msra.mxu1 %v5482_v27 }
 0x30f   :  { %3895 = vmatprep.subr.bf16.mxu0 %v5487_v29  ;;  %4059 = vmatprep.subr.bf16.mxu1 %v5490_v30 }
 0x312   :  { %3896 = vmatpush1.bf16.msra.mxu0 %v5485_v44  ;;  %4060 = vmatpush1.bf16.msra.mxu1 %v5488_v32 }
 0x313   :  { %3897 = vmatprep.subr.bf16.mxu0 %v5493_v35  ;;  %4061 = vmatprep.subr.bf16.mxu1 %v5496_v37 }
 0x316   :  { %3898 = vmatpush1.bf16.msra.mxu0 %v5491_v38  ;;  %4062 = vmatpush1.bf16.msra.mxu1 %v5494_v39 }
 0x317   :  { %3899 = vmatprep.subr.bf16.mxu0 %v5499_v41  ;;  %4063 = vmatprep.subr.bf16.mxu1 %v5502_v42  ;;  %v4965_v42 = vld [vmem:[%s5911_s8] ss:$0 sm:$0xff] }
 0x31a   :  { %3900 = vmatpush1.bf16.msra.mxu0 %v5497_v4  ;;  %4064 = vmatpush1.bf16.msra.mxu1 %v5500_v46 }
 0x31b   :  { %4998 = vmatprep.subr.bf16.mxu0 %v5503_v34  ;;  %5020 = vmatprep.subr.bf16.mxu1 %v5504_v45 }
 0x31d   :  { %3902 = vmatmul.mubr.bf16.vlgmr.msra.gmra.mrb[12].mxu0 %v2186_v49  ;;  %4066 = vmatmul.mubr.bf16.vlgmr.msra.gmra.mrb[12].mxu1 %v2186_v49 }
 0x31e   :  { %4999 = vmatpush3.bf16.msra.mxu0 %v5505_v47  ;;  %5021 = vmatpush3.bf16.msra.mxu1 %v5506_v48 }
 0x31f   :  { %5000 = vmatprep.subr.bf16.mxu0 %v5507_v11  ;;  %5022 = vmatprep.subr.bf16.mxu1 %v5508_v50 }
 0x322   :  { %5001 = vmatpush3.bf16.msra.mxu0 %v5509_v54  ;;  %5023 = vmatpush3.bf16.msra.mxu1 %v5510_v51 }
 0x323   :  { %5002 = vmatprep.subr.bf16.mxu0 %v5511_v52  ;;  %5024 = vmatprep.subr.bf16.mxu1 %v5512_v53 }
 0x326   :  { %5003 = vmatpush3.bf16.msra.mxu0 %v5513_v55  ;;  %5025 = vmatpush3.bf16.msra.mxu1 %v5514_v56 }
 0x327   :  { %5004 = vmatprep.subr.bf16.mxu0 %v5515_v22  ;;  %5026 = vmatprep.subr.bf16.mxu1 %v5516_v57 }
 0x32a   :  { %5005 = vmatpush3.bf16.msra.mxu0 %v5517_v58  ;;  %5027 = vmatpush3.bf16.msra.mxu1 %v5518_v59 }
 0x32b   :  { %5006 = vmatprep.subr.bf16.mxu0 %v5519_v60  ;;  %5028 = vmatprep.subr.bf16.mxu1 %v5520_v61 }
 0x32e   :  { %5007 = vmatpush3.bf16.msra.mxu0 %v5521_v62  ;;  %5029 = vmatpush3.bf16.msra.mxu1 %v5522_v63 }
 0x32f   :  { %5008 = vmatprep.subr.bf16.mxu0 %v5523_v0  ;;  %5030 = vmatprep.subr.bf16.mxu1 %v5524_v1 }
 0x332   :  { %5009 = vmatpush3.bf16.msra.mxu0 %v5525_v36  ;;  %5031 = vmatpush3.bf16.msra.mxu1 %v5526_v2 }
 0x333   :  { %5010 = vmatprep.subr.bf16.mxu0 %v5527_v40  ;;  %5032 = vmatprep.subr.bf16.mxu1 %v5528_v3 }
 0x336   :  { %5011 = vmatpush3.bf16.msra.mxu0 %v5529_v5  ;;  %5033 = vmatpush3.bf16.msra.mxu1 %v5530_v6 }
 0x337   :  { %5012 = vmatprep.subr.bf16.mxu0 %v5531_v7  ;;  %5034 = vmatprep.subr.bf16.mxu1 %v5532_v8 }
 0x33a   :  { %5013 = vmatpush3.bf16.msra.mxu0 %v5533_v9  ;;  %5035 = vmatpush3.bf16.msra.mxu1 %v5534_v10 }
 0x3f0   :  { %v3903_v17 = vpop.f32.mrb[12].mxu0  ;;  %v4067_v18 = vpop.f32.mrb[12].mxu1 }
 0x3f1   :  { %v5050_v19 = vadd.f32 %v3903_v17, %v2449_v13  ;;  %v5052_v24 = vadd.f32 %v4067_v18, %v2457_v14  ;;  %v3905_v26 = vpop.f32.mrb[13].mxu0  ;;  %v4069_v27 = vpop.f32.mrb[13].mxu1 }
 0x3f2   :  { %v5051_v28 = vadd.f32 %v3905_v26, %v2453_v15  ;;  %v5053_v29 = vadd.f32 %v4069_v27, %v2461_v16  ;;  %v3907_v30 = vpop.f32.mrb[14].mxu0  ;;  %v4071_v44 = vpop.f32.mrb[14].mxu1 }
 0x3f3   :  { %v4074_v32 = vmax.f32 %v5050_v19, 0.0  ;;  %v4076_v33 = vmax.f32 %v5052_v24, 0.0  ;;  %v3908_v35 = vpop.f32.mrb[15].mxu0  ;;  %v4072_v21 = vpop.f32.mrb[15].mxu1 }
 0x3f4   :  { %v4075_v37 = vmax.f32 %v5051_v28, 0.0  ;;  %v4077_v31 = vmax.f32 %v5053_v29, 0.0 }
 0x3f5   :  { %v4078_v39 = vpack.c.bf16 %v4074_v32, %v4074_v32  ;;  %v4080_v25 = vpack.c.bf16 %v4076_v33, %v4076_v33 }
 0x3f6   :  { %v4079_v38 = vpack.c.bf16 %v4075_v37, %v4075_v37  ;;  %v4081_v23 = vpack.c.bf16 %v4077_v31, %v4077_v31 }
 0x3f8   :  { %4377 = vmatprep.mubr.bf16.mxu0 %v4079_v38  ;;  %4417 = vmatprep.mubr.bf16.mxu1 %v4081_v23 }
 0x3f9   :  { %4378 = vmatmul.mubr.bf16.vlgmr.msra.gmra.mrb[16].mxu0 %v4078_v39  ;;  %4418 = vmatmul.mubr.bf16.vlgmr.msra.gmra.mrb[16].mxu1 %v4080_v25 }
 0x4cc   :  { %v5014_v20 = vpop.f32.mrb[16].mxu0  ;;  %v5036_v41 = vpop.f32.mrb[16].mxu1 }
 0x4cd   :  { %v5015_v4 = vpop.f32.mrb[17].mxu0  ;;  %v5037_v46 = vpop.f32.mrb[17].mxu1 }
 0x4ce   :  { %v5016_v43 = vadd.f32 %v5015_v4, %v5014_v20  ;;  %v5038_v34 = vadd.f32 %v5037_v46, %v5036_v41  ;;  %v5017_v45 = vpop.f32.mrb[18].mxu0  ;;  %v5039_v47 = vpop.f32.mrb[18].mxu1 }
 0x4cf   :  { %v5018_v48 = vpop.f32.mrb[19].mxu0  ;;  %v5040_v49 = vpop.f32.mrb[19].mxu1 }
 0x4d0   :  { %v4380_v11 = vadd.f32 %v5016_v43, %v4965_v42 }
 0x4d2   :  { %v4420_v50 = vadd.f32 %v5038_v34, %v4380_v11 }
 0x4d4   :  { %4425 = vst [vmem:[#allocation11] sm:$0xff] %v4420_v50 }
 0x4d5   :  { %5656 = shalt.err (!%p5653_p2)
}
 0x4d6   :  { %s5657_s26 = scalar_lea.hbm %s5912_s9, 128 }
 0x4d7   :  { %p5658_p3 = scmp.ne.s32.totalorder %s5912_s9, %s5657_s26  ;;  %p5661_p4 = scmp.lt.u32.totalorder %s5657_s26, %s5912_s9 }
 0x4d9   :  { %p5663_p5 = pnand %p5661_p4, %p5658_p3 }
 0x4db   :  { %5666 = shalt.err (!%p5663_p5)
}
 0x4dc   :  { %4435 = dma.vmem_to_hbm [thread:$0]  %s4433_s13, 128, %s5912_s9, [#allocation4]  }
 0x4dd   :  { %5673 = dma.done.wait [#allocation4], 128  }
 0x4de   :  { %5674 = vsyncadd [#allocation4], 4294967168 }
 0x4df   :  { %4439 = vsyncpa [#allocation3], 1 }
 0x4e0   :  { %4440 = vsyncpa [#allocation6], 1 }
 0x4e1   :  { %4441 = vsyncpa [#allocation9], 1 }
 0x4e2   :  { %4442 = vsyncpa [#allocation4], 1 }

</bundles_post_ra>
